<compile_context>
chip_gen: v7x
topology: tpu7x:2x2x1
jax: 0.10.0
libtpu: 0.0.40
codegen_flags: <defaults>
</compile_context>

<pallas_src>
import functools
import math

import jax
import jax.numpy as jnp
from jax import lax
from jax.experimental import pallas as pl
from jax.experimental.pallas import tpu as pltpu


def _mha_kernel(q_ref, k_ref, v_ref, mask_ref,
                wq_ref, bq_ref, wk_ref, bk_ref, wv_ref, bv_ref,
                wo_ref, bo_ref, out_ref, *, heads, d_k, scale):
    # One batch element per grid step; all operands for it are in VMEM.
    x_q = q_ref[0]                       # (S, D)
    x_k = k_ref[0]                       # (S, D)
    x_v = v_ref[0]                       # (S, D)
    mask0 = mask_ref[0, 0] == 0          # (S, S) bool, shared by all heads

    # Input projections: one lane-dense (S, D) @ (D, D) MXU matmul each.
    q = jnp.dot(x_q, wq_ref[...], preferred_element_type=jnp.float32) + bq_ref[...]
    k = jnp.dot(x_k, wk_ref[...], preferred_element_type=jnp.float32) + bk_ref[...]
    v = jnp.dot(x_v, wv_ref[...], preferred_element_type=jnp.float32) + bv_ref[...]

    neg_big = jnp.float32(-1e9)
    acc = jnp.zeros(out_ref.shape[1:], dtype=jnp.float32)   # (S, D)

    # Static loop over heads; each head is a static lane-slice of the packed
    # (S, D) projections (no gathers / big transposes).
    for h in range(heads):
        sl = slice(h * d_k, (h + 1) * d_k)
        qh = q[:, sl]                    # (S, d_k)
        kh = k[:, sl]                    # (S, d_k)
        vh = v[:, sl]                    # (S, d_k)

        # scores = qh @ kh^T / sqrt(d_k)   (contract over d_k, no transpose op)
        s = lax.dot_general(qh, kh, (((1,), (1,)), ((), ())),
                            preferred_element_type=jnp.float32) * scale
        s = jnp.where(mask0, neg_big, s)

        # Numerically stable softmax along the key axis.
        s_max = jnp.max(s, axis=-1, keepdims=True)
        p = jnp.exp(s - s_max)
        p = p * pl.reciprocal(jnp.sum(p, axis=-1, keepdims=True), approx=True)
        # (eval-mode dropout on p is the identity — see TODO above)

        oh = jnp.dot(p, vh, preferred_element_type=jnp.float32)   # (S, d_k)

        # Fold the output projection per head:
        #   concat_h(o_h) @ Wo == sum_h o_h @ Wo[h*d_k:(h+1)*d_k, :]
        acc = acc + jnp.dot(oh, wo_ref[sl, :], preferred_element_type=jnp.float32)

    out_ref[0] = (acc + bo_ref[...]).astype(out_ref.dtype)


def multi_head_attention(query, key, value, mask, params, heads):
    """query/key/value: (B, S, D) f32, mask: (B, 1, S, S) int32 -> (B, S, D) f32."""
    B, S, D = query.shape
    assert D % heads == 0
    d_k = D // heads
    wq, bq, wk, bk, wv, bv, wo, bo = params
    bq = bq.reshape(1, D)
    bk = bk.reshape(1, D)
    bv = bv.reshape(1, D)
    bo = bo.reshape(1, D)

    kernel = functools.partial(_mha_kernel, heads=heads, d_k=d_k,
                               scale=1.0 / math.sqrt(d_k))

    x_spec = pl.BlockSpec((1, S, D), lambda b: (b, 0, 0))
    mask_spec = pl.BlockSpec((1, 1, S, S), lambda b: (b, 0, 0, 0))
    w_spec = pl.BlockSpec((D, D), lambda b: (0, 0))     # same block every step -> DMA deduped
    b_spec = pl.BlockSpec((1, D), lambda b: (0, 0))

    # Advisory cost estimate so XLA can overlap neighbours with this call.
    flops = int(B * (4 * 2 * S * D * D + heads * 2 * 2 * S * S * d_k))
    cost = pl.CostEstimate(
        flops=flops,
        transcendentals=int(B * heads * S * S),
        bytes_accessed=int(4 * (4 * B * S * D + B * S * S + 4 * D * D + 4 * D)),
    )

    return pl.pallas_call(
        kernel,
        out_shape=jax.ShapeDtypeStruct((B, S, D), query.dtype),
        grid_spec=pltpu.PrefetchScalarGridSpec(
            num_scalar_prefetch=0,
            grid=(B,),
            in_specs=[x_spec, x_spec, x_spec, mask_spec,
                      w_spec, b_spec, w_spec, b_spec, w_spec, b_spec,
                      w_spec, b_spec],
            out_specs=pl.BlockSpec((1, S, D), lambda b: (b, 0, 0)),
        ),
        compiler_params=pltpu.CompilerParams(
            dimension_semantics=("parallel",),
        ),
        cost_estimate=cost,
    )(query, key, value, mask, wq, bq, wk, bk, wv, bv, wo, bo)


def _mha_reference(q_in, k_in, v_in, mask, params, heads):
    """Plain-JAX reference matching the PyTorch forward (eval mode)."""
    wq, bq, wk, bk, wv, bv, wo, bo = params
    B, S, D = q_in.shape
    d_k = D // heads
    q = q_in @ wq + bq
    k = k_in @ wk + bk
    v = v_in @ wv + bv

    def split(x):
        return x.reshape(B, S, heads, d_k).transpose(0, 2, 1, 3)

    q, k, v = split(q), split(k), split(v)
    s = jnp.einsum("bhqd,bhkd->bhqk", q, k) / jnp.sqrt(jnp.float32(d_k))
    s = jnp.where(mask == 0, jnp.float32(-1e9), s)
    p = jax.nn.softmax(s, axis=-1)
    o = jnp.einsum("bhqk,bhkd->bhqd", p, v)
    o = o.transpose(0, 2, 1, 3).reshape(B, S, D)
    return o @ wo + bo


if __name__ == "__main__":
    # Small shapes consistent with the module's forward.
    d_model, heads = 128, 4
    batch, seq = 2, 8

    key0 = jax.random.PRNGKey(0)
    ks = jax.random.split(key0, 11)
    w_scale = 1.0 / math.sqrt(d_model)

    # Deterministic "parameters" (nn.Linear weights, stored pre-transposed).
    wq = jax.random.normal(ks[0], (d_model, d_model), jnp.float32) * w_scale
    wk = jax.random.normal(ks[1], (d_model, d_model), jnp.float32) * w_scale
    wv = jax.random.normal(ks[2], (d_model, d_model), jnp.float32) * w_scale
    wo = jax.random.normal(ks[3], (d_model, d_model), jnp.float32) * w_scale
    bq = jax.random.normal(ks[4], (d_model,), jnp.float32) * 0.1
    bk = jax.random.normal(ks[5], (d_model,), jnp.float32) * 0.1
    bv = jax.random.normal(ks[6], (d_model,), jnp.float32) * 0.1
    bo = jax.random.normal(ks[7], (d_model,), jnp.float32) * 0.1
    params = (wq, bq, wk, bk, wv, bv, wo, bo)

    # Deterministic inputs + a causal mask (0 => masked, matches mask == 0 fill).
    q_in = jax.random.normal(ks[8], (batch, seq, d_model), jnp.float32)
    k_in = jax.random.normal(ks[9], (batch, seq, d_model), jnp.float32)
    v_in = jax.random.normal(ks[10], (batch, seq, d_model), jnp.float32)
    causal = jnp.tril(jnp.ones((seq, seq), dtype=jnp.int32))
    mask = jnp.broadcast_to(causal[None, None], (batch, 1, seq, seq))

    out = multi_head_attention(q_in, k_in, v_in, mask, params, heads)
    out = jax.block_until_ready(out)

    ref = _mha_reference(q_in, k_in, v_in, mask, params, heads)
    assert out.shape == (batch, seq, d_model)
    assert jnp.allclose(out, ref, atol=1e-2, rtol=1e-2), (
        float(jnp.max(jnp.abs(out - ref))))

    print("KERNEL_OK")
</pallas_src>

<mosaic_0001>
module attributes {stable_mosaic.version = 11 : i64} {
  func.func @_mha_kernel(%arg0: i32, %arg1: memref<1x8x128xf32, #tpu.memory_space<vmem>>, %arg2: memref<1x8x128xf32, #tpu.memory_space<vmem>>, %arg3: memref<1x8x128xf32, #tpu.memory_space<vmem>>, %arg4: memref<1x1x8x8xi32, #tpu.memory_space<vmem>>, %arg5: memref<128x128xf32, #tpu.memory_space<vmem>>, %arg6: memref<1x128xf32, #tpu.memory_space<vmem>>, %arg7: memref<128x128xf32, #tpu.memory_space<vmem>>, %arg8: memref<1x128xf32, #tpu.memory_space<vmem>>, %arg9: memref<128x128xf32, #tpu.memory_space<vmem>>, %arg10: memref<1x128xf32, #tpu.memory_space<vmem>>, %arg11: memref<128x128xf32, #tpu.memory_space<vmem>>, %arg12: memref<1x128xf32, #tpu.memory_space<vmem>>, %arg13: memref<1x8x128xf32, #tpu.memory_space<vmem>>) attributes {dimension_semantics = [#tpu.dimension_semantics<parallel>], iteration_bounds = array<i64: 2>, scalar_prefetch = 0 : i64, scratch_operands = 0 : i64, tpu.core_type = #tpu.core_type<tc>, window_params = [{transform_indices = @transform_0, window_bounds = array<i64: 1, 8, 128>}, {transform_indices = @transform_1, window_bounds = array<i64: 1, 8, 128>}, {transform_indices = @transform_2, window_bounds = array<i64: 1, 8, 128>}, {transform_indices = @transform_3, window_bounds = array<i64: 1, 1, 8, 8>}, {pipeline_mode = #tpu.pipeline_mode<synchronous>, transform_indices = @transform_4, window_bounds = array<i64: 128, 128>}, {pipeline_mode = #tpu.pipeline_mode<synchronous>, transform_indices = @transform_5, window_bounds = array<i64: 1, 128>}, {pipeline_mode = #tpu.pipeline_mode<synchronous>, transform_indices = @transform_6, window_bounds = array<i64: 128, 128>}, {pipeline_mode = #tpu.pipeline_mode<synchronous>, transform_indices = @transform_7, window_bounds = array<i64: 1, 128>}, {pipeline_mode = #tpu.pipeline_mode<synchronous>, transform_indices = @transform_8, window_bounds = array<i64: 128, 128>}, {pipeline_mode = #tpu.pipeline_mode<synchronous>, transform_indices = @transform_9, window_bounds = array<i64: 1, 128>}, {pipeline_mode = #tpu.pipeline_mode<synchronous>, transform_indices = @transform_10, window_bounds = array<i64: 128, 128>}, {pipeline_mode = #tpu.pipeline_mode<synchronous>, transform_indices = @transform_11, window_bounds = array<i64: 1, 128>}, {transform_indices = @transform_12, window_bounds = array<i64: 1, 8, 128>}]} {
    %c0 = arith.constant 0 : index
    %c0_0 = arith.constant 0 : index
    %c0_1 = arith.constant 0 : index
    %0 = vector.load %arg1[%c0, %c0_0, %c0_1] : memref<1x8x128xf32, #tpu.memory_space<vmem>>, vector<1x8x128xf32>
    %1 = vector.shape_cast %0 : vector<1x8x128xf32> to vector<8x128xf32>
    %c0_2 = arith.constant 0 : index
    %c0_3 = arith.constant 0 : index
    %c0_4 = arith.constant 0 : index
    %2 = vector.load %arg2[%c0_2, %c0_3, %c0_4] : memref<1x8x128xf32, #tpu.memory_space<vmem>>, vector<1x8x128xf32>
    %3 = vector.shape_cast %2 : vector<1x8x128xf32> to vector<8x128xf32>
    %c0_5 = arith.constant 0 : index
    %c0_6 = arith.constant 0 : index
    %c0_7 = arith.constant 0 : index
    %4 = vector.load %arg3[%c0_5, %c0_6, %c0_7] : memref<1x8x128xf32, #tpu.memory_space<vmem>>, vector<1x8x128xf32>
    %5 = vector.shape_cast %4 : vector<1x8x128xf32> to vector<8x128xf32>
    %c0_8 = arith.constant 0 : index
    %c0_9 = arith.constant 0 : index
    %c0_10 = arith.constant 0 : index
    %c0_11 = arith.constant 0 : index
    %6 = vector.load %arg4[%c0_8, %c0_9, %c0_10, %c0_11] : memref<1x1x8x8xi32, #tpu.memory_space<vmem>>, vector<1x1x8x8xi32>
    %7 = vector.shape_cast %6 : vector<1x1x8x8xi32> to vector<8x8xi32>
    %c0_i32 = arith.constant 0 : i32
    %8 = vector.broadcast %c0_i32 : i32 to vector<8x8xi32>
    %9 = arith.cmpi eq, %7, %8 : vector<8x8xi32>
    %c0_12 = arith.constant 0 : index
    %c0_13 = arith.constant 0 : index
    %10 = vector.load %arg5[%c0_12, %c0_13] : memref<128x128xf32, #tpu.memory_space<vmem>>, vector<128x128xf32>
    %cst = arith.constant dense<0.000000e+00> : vector<8x128xf32>
    %11 = tpu.matmul %1, %10, %cst {dimension_numbers = #tpu.dot_dimension_numbers<[1], [0], [0], [1], [0, 0, 1, 1], [], []>} : vector<8x128xf32>, vector<128x128xf32>, vector<8x128xf32> -> vector<8x128xf32>
    %c0_14 = arith.constant 0 : index
    %c0_15 = arith.constant 0 : index
    %12 = vector.load %arg6[%c0_14, %c0_15] : memref<1x128xf32, #tpu.memory_space<vmem>>, vector<1x128xf32>
    %13 = vector.broadcast %12 : vector<1x128xf32> to vector<8x128xf32>
    %14 = arith.addf %11, %13 : vector<8x128xf32>
    %c0_16 = arith.constant 0 : index
    %c0_17 = arith.constant 0 : index
    %15 = vector.load %arg7[%c0_16, %c0_17] : memref<128x128xf32, #tpu.memory_space<vmem>>, vector<128x128xf32>
    %cst_18 = arith.constant dense<0.000000e+00> : vector<8x128xf32>
    %16 = tpu.matmul %3, %15, %cst_18 {dimension_numbers = #tpu.dot_dimension_numbers<[1], [0], [0], [1], [0, 0, 1, 1], [], []>} : vector<8x128xf32>, vector<128x128xf32>, vector<8x128xf32> -> vector<8x128xf32>
    %c0_19 = arith.constant 0 : index
    %c0_20 = arith.constant 0 : index
    %17 = vector.load %arg8[%c0_19, %c0_20] : memref<1x128xf32, #tpu.memory_space<vmem>>, vector<1x128xf32>
    %18 = vector.broadcast %17 : vector<1x128xf32> to vector<8x128xf32>
    %19 = arith.addf %16, %18 : vector<8x128xf32>
    %c0_21 = arith.constant 0 : index
    %c0_22 = arith.constant 0 : index
    %20 = vector.load %arg9[%c0_21, %c0_22] : memref<128x128xf32, #tpu.memory_space<vmem>>, vector<128x128xf32>
    %cst_23 = arith.constant dense<0.000000e+00> : vector<8x128xf32>
    %21 = tpu.matmul %5, %20, %cst_23 {dimension_numbers = #tpu.dot_dimension_numbers<[1], [0], [0], [1], [0, 0, 1, 1], [], []>} : vector<8x128xf32>, vector<128x128xf32>, vector<8x128xf32> -> vector<8x128xf32>
    %c0_24 = arith.constant 0 : index
    %c0_25 = arith.constant 0 : index
    %22 = vector.load %arg10[%c0_24, %c0_25] : memref<1x128xf32, #tpu.memory_space<vmem>>, vector<1x128xf32>
    %23 = vector.broadcast %22 : vector<1x128xf32> to vector<8x128xf32>
    %24 = arith.addf %21, %23 : vector<8x128xf32>
    %cst_26 = arith.constant 0.000000e+00 : f32
    %25 = vector.broadcast %cst_26 : f32 to vector<8x128xf32>
    %26 = vector.extract_strided_slice %14 {offsets = [0, 0], sizes = [8, 32], strides = [1, 1]} : vector<8x128xf32> to vector<8x32xf32>
    %27 = vector.extract_strided_slice %19 {offsets = [0, 0], sizes = [8, 32], strides = [1, 1]} : vector<8x128xf32> to vector<8x32xf32>
    %28 = vector.extract_strided_slice %24 {offsets = [0, 0], sizes = [8, 32], strides = [1, 1]} : vector<8x128xf32> to vector<8x32xf32>
    %cst_27 = arith.constant dense<0.000000e+00> : vector<8x8xf32>
    %29 = tpu.matmul %26, %27, %cst_27 {dimension_numbers = #tpu.dot_dimension_numbers<[1], [1], [0], [0], [0, 0, 1, 0], [], []>} : vector<8x32xf32>, vector<8x32xf32>, vector<8x8xf32> -> vector<8x8xf32>
    %cst_28 = arith.constant 0.176776692 : f32
    %30 = vector.broadcast %cst_28 : f32 to vector<8x8xf32>
    %31 = arith.mulf %29, %30 : vector<8x8xf32>
    %cst_29 = arith.constant -1.000000e+09 : f32
    %32 = vector.broadcast %cst_29 : f32 to vector<8x8xf32>
    %33 = arith.select %9, %32, %31 : vector<8x8xi1>, vector<8x8xf32>
    %cst_30 = arith.constant dense<0xFF800000> : vector<8xf32>
    %34 = vector.multi_reduction <maximumf>, %33, %cst_30 [1] : vector<8x8xf32> to vector<8xf32>
    %35 = vector.shape_cast %34 : vector<8xf32> to vector<8x1xf32>
    %36 = vector.broadcast %35 : vector<8x1xf32> to vector<8x8xf32>
    %37 = arith.subf %33, %36 : vector<8x8xf32>
    %38 = math.exp %37 : vector<8x8xf32>
    %cst_31 = arith.constant dense<0.000000e+00> : vector<8xf32>
    %39 = vector.multi_reduction <add>, %38, %cst_31 [1] : vector<8x8xf32> to vector<8xf32>
    %40 = vector.shape_cast %39 : vector<8xf32> to vector<8x1xf32>
    %41 = tpu.reciprocal %40 {approx = true} : vector<8x1xf32> -> vector<8x1xf32>
    %42 = vector.broadcast %41 : vector<8x1xf32> to vector<8x8xf32>
    %43 = arith.mulf %38, %42 : vector<8x8xf32>
    %cst_32 = arith.constant dense<0.000000e+00> : vector<8x32xf32>
    %44 = tpu.matmul %43, %28, %cst_32 {dimension_numbers = #tpu.dot_dimension_numbers<[1], [0], [0], [1], [0, 0, 1, 1], [], []>} : vector<8x8xf32>, vector<8x32xf32>, vector<8x32xf32> -> vector<8x32xf32>
    %c0_33 = arith.constant 0 : index
    %c0_34 = arith.constant 0 : index
    %45 = vector.load %arg11[%c0_33, %c0_34] : memref<128x128xf32, #tpu.memory_space<vmem>>, vector<32x128xf32>
    %cst_35 = arith.constant dense<0.000000e+00> : vector<8x128xf32>
    %46 = tpu.matmul %44, %45, %cst_35 {dimension_numbers = #tpu.dot_dimension_numbers<[1], [0], [0], [1], [0, 0, 1, 1], [], []>} : vector<8x32xf32>, vector<32x128xf32>, vector<8x128xf32> -> vector<8x128xf32>
    %47 = arith.addf %25, %46 : vector<8x128xf32>
    %48 = vector.extract_strided_slice %14 {offsets = [0, 32], sizes = [8, 32], strides = [1, 1]} : vector<8x128xf32> to vector<8x32xf32>
    %49 = vector.extract_strided_slice %19 {offsets = [0, 32], sizes = [8, 32], strides = [1, 1]} : vector<8x128xf32> to vector<8x32xf32>
    %50 = vector.extract_strided_slice %24 {offsets = [0, 32], sizes = [8, 32], strides = [1, 1]} : vector<8x128xf32> to vector<8x32xf32>
    %cst_36 = arith.constant dense<0.000000e+00> : vector<8x8xf32>
    %51 = tpu.matmul %48, %49, %cst_36 {dimension_numbers = #tpu.dot_dimension_numbers<[1], [1], [0], [0], [0, 0, 1, 0], [], []>} : vector<8x32xf32>, vector<8x32xf32>, vector<8x8xf32> -> vector<8x8xf32>
    %cst_37 = arith.constant 0.176776692 : f32
    %52 = vector.broadcast %cst_37 : f32 to vector<8x8xf32>
    %53 = arith.mulf %51, %52 : vector<8x8xf32>
    %cst_38 = arith.constant -1.000000e+09 : f32
    %54 = vector.broadcast %cst_38 : f32 to vector<8x8xf32>
    %55 = arith.select %9, %54, %53 : vector<8x8xi1>, vector<8x8xf32>
    %cst_39 = arith.constant dense<0xFF800000> : vector<8xf32>
    %56 = vector.multi_reduction <maximumf>, %55, %cst_39 [1] : vector<8x8xf32> to vector<8xf32>
    %57 = vector.shape_cast %56 : vector<8xf32> to vector<8x1xf32>
    %58 = vector.broadcast %57 : vector<8x1xf32> to vector<8x8xf32>
    %59 = arith.subf %55, %58 : vector<8x8xf32>
    %60 = math.exp %59 : vector<8x8xf32>
    %cst_40 = arith.constant dense<0.000000e+00> : vector<8xf32>
    %61 = vector.multi_reduction <add>, %60, %cst_40 [1] : vector<8x8xf32> to vector<8xf32>
    %62 = vector.shape_cast %61 : vector<8xf32> to vector<8x1xf32>
    %63 = tpu.reciprocal %62 {approx = true} : vector<8x1xf32> -> vector<8x1xf32>
    %64 = vector.broadcast %63 : vector<8x1xf32> to vector<8x8xf32>
    %65 = arith.mulf %60, %64 : vector<8x8xf32>
    %cst_41 = arith.constant dense<0.000000e+00> : vector<8x32xf32>
    %66 = tpu.matmul %65, %50, %cst_41 {dimension_numbers = #tpu.dot_dimension_numbers<[1], [0], [0], [1], [0, 0, 1, 1], [], []>} : vector<8x8xf32>, vector<8x32xf32>, vector<8x32xf32> -> vector<8x32xf32>
    %c32 = arith.constant 32 : index
    %c0_42 = arith.constant 0 : index
    %67 = vector.load %arg11[%c32, %c0_42] : memref<128x128xf32, #tpu.memory_space<vmem>>, vector<32x128xf32>
    %cst_43 = arith.constant dense<0.000000e+00> : vector<8x128xf32>
    %68 = tpu.matmul %66, %67, %cst_43 {dimension_numbers = #tpu.dot_dimension_numbers<[1], [0], [0], [1], [0, 0, 1, 1], [], []>} : vector<8x32xf32>, vector<32x128xf32>, vector<8x128xf32> -> vector<8x128xf32>
    %69 = arith.addf %47, %68 : vector<8x128xf32>
    %70 = vector.extract_strided_slice %14 {offsets = [0, 64], sizes = [8, 32], strides = [1, 1]} : vector<8x128xf32> to vector<8x32xf32>
    %71 = vector.extract_strided_slice %19 {offsets = [0, 64], sizes = [8, 32], strides = [1, 1]} : vector<8x128xf32> to vector<8x32xf32>
    %72 = vector.extract_strided_slice %24 {offsets = [0, 64], sizes = [8, 32], strides = [1, 1]} : vector<8x128xf32> to vector<8x32xf32>
    %cst_44 = arith.constant dense<0.000000e+00> : vector<8x8xf32>
    %73 = tpu.matmul %70, %71, %cst_44 {dimension_numbers = #tpu.dot_dimension_numbers<[1], [1], [0], [0], [0, 0, 1, 0], [], []>} : vector<8x32xf32>, vector<8x32xf32>, vector<8x8xf32> -> vector<8x8xf32>
    %cst_45 = arith.constant 0.176776692 : f32
    %74 = vector.broadcast %cst_45 : f32 to vector<8x8xf32>
    %75 = arith.mulf %73, %74 : vector<8x8xf32>
    %cst_46 = arith.constant -1.000000e+09 : f32
    %76 = vector.broadcast %cst_46 : f32 to vector<8x8xf32>
    %77 = arith.select %9, %76, %75 : vector<8x8xi1>, vector<8x8xf32>
    %cst_47 = arith.constant dense<0xFF800000> : vector<8xf32>
    %78 = vector.multi_reduction <maximumf>, %77, %cst_47 [1] : vector<8x8xf32> to vector<8xf32>
    %79 = vector.shape_cast %78 : vector<8xf32> to vector<8x1xf32>
    %80 = vector.broadcast %79 : vector<8x1xf32> to vector<8x8xf32>
    %81 = arith.subf %77, %80 : vector<8x8xf32>
    %82 = math.exp %81 : vector<8x8xf32>
    %cst_48 = arith.constant dense<0.000000e+00> : vector<8xf32>
    %83 = vector.multi_reduction <add>, %82, %cst_48 [1] : vector<8x8xf32> to vector<8xf32>
    %84 = vector.shape_cast %83 : vector<8xf32> to vector<8x1xf32>
    %85 = tpu.reciprocal %84 {approx = true} : vector<8x1xf32> -> vector<8x1xf32>
    %86 = vector.broadcast %85 : vector<8x1xf32> to vector<8x8xf32>
    %87 = arith.mulf %82, %86 : vector<8x8xf32>
    %cst_49 = arith.constant dense<0.000000e+00> : vector<8x32xf32>
    %88 = tpu.matmul %87, %72, %cst_49 {dimension_numbers = #tpu.dot_dimension_numbers<[1], [0], [0], [1], [0, 0, 1, 1], [], []>} : vector<8x8xf32>, vector<8x32xf32>, vector<8x32xf32> -> vector<8x32xf32>
    %c64 = arith.constant 64 : index
    %c0_50 = arith.constant 0 : index
    %89 = vector.load %arg11[%c64, %c0_50] : memref<128x128xf32, #tpu.memory_space<vmem>>, vector<32x128xf32>
    %cst_51 = arith.constant dense<0.000000e+00> : vector<8x128xf32>
    %90 = tpu.matmul %88, %89, %cst_51 {dimension_numbers = #tpu.dot_dimension_numbers<[1], [0], [0], [1], [0, 0, 1, 1], [], []>} : vector<8x32xf32>, vector<32x128xf32>, vector<8x128xf32> -> vector<8x128xf32>
    %91 = arith.addf %69, %90 : vector<8x128xf32>
    %92 = vector.extract_strided_slice %14 {offsets = [0, 96], sizes = [8, 32], strides = [1, 1]} : vector<8x128xf32> to vector<8x32xf32>
    %93 = vector.extract_strided_slice %19 {offsets = [0, 96], sizes = [8, 32], strides = [1, 1]} : vector<8x128xf32> to vector<8x32xf32>
    %94 = vector.extract_strided_slice %24 {offsets = [0, 96], sizes = [8, 32], strides = [1, 1]} : vector<8x128xf32> to vector<8x32xf32>
    %cst_52 = arith.constant dense<0.000000e+00> : vector<8x8xf32>
    %95 = tpu.matmul %92, %93, %cst_52 {dimension_numbers = #tpu.dot_dimension_numbers<[1], [1], [0], [0], [0, 0, 1, 0], [], []>} : vector<8x32xf32>, vector<8x32xf32>, vector<8x8xf32> -> vector<8x8xf32>
    %cst_53 = arith.constant 0.176776692 : f32
    %96 = vector.broadcast %cst_53 : f32 to vector<8x8xf32>
    %97 = arith.mulf %95, %96 : vector<8x8xf32>
    %cst_54 = arith.constant -1.000000e+09 : f32
    %98 = vector.broadcast %cst_54 : f32 to vector<8x8xf32>
    %99 = arith.select %9, %98, %97 : vector<8x8xi1>, vector<8x8xf32>
    %cst_55 = arith.constant dense<0xFF800000> : vector<8xf32>
    %100 = vector.multi_reduction <maximumf>, %99, %cst_55 [1] : vector<8x8xf32> to vector<8xf32>
    %101 = vector.shape_cast %100 : vector<8xf32> to vector<8x1xf32>
    %102 = vector.broadcast %101 : vector<8x1xf32> to vector<8x8xf32>
    %103 = arith.subf %99, %102 : vector<8x8xf32>
    %104 = math.exp %103 : vector<8x8xf32>
    %cst_56 = arith.constant dense<0.000000e+00> : vector<8xf32>
    %105 = vector.multi_reduction <add>, %104, %cst_56 [1] : vector<8x8xf32> to vector<8xf32>
    %106 = vector.shape_cast %105 : vector<8xf32> to vector<8x1xf32>
    %107 = tpu.reciprocal %106 {approx = true} : vector<8x1xf32> -> vector<8x1xf32>
    %108 = vector.broadcast %107 : vector<8x1xf32> to vector<8x8xf32>
    %109 = arith.mulf %104, %108 : vector<8x8xf32>
    %cst_57 = arith.constant dense<0.000000e+00> : vector<8x32xf32>
    %110 = tpu.matmul %109, %94, %cst_57 {dimension_numbers = #tpu.dot_dimension_numbers<[1], [0], [0], [1], [0, 0, 1, 1], [], []>} : vector<8x8xf32>, vector<8x32xf32>, vector<8x32xf32> -> vector<8x32xf32>
    %c96 = arith.constant 96 : index
    %c0_58 = arith.constant 0 : index
    %111 = vector.load %arg11[%c96, %c0_58] : memref<128x128xf32, #tpu.memory_space<vmem>>, vector<32x128xf32>
    %cst_59 = arith.constant dense<0.000000e+00> : vector<8x128xf32>
    %112 = tpu.matmul %110, %111, %cst_59 {dimension_numbers = #tpu.dot_dimension_numbers<[1], [0], [0], [1], [0, 0, 1, 1], [], []>} : vector<8x32xf32>, vector<32x128xf32>, vector<8x128xf32> -> vector<8x128xf32>
    %113 = arith.addf %91, %112 : vector<8x128xf32>
    %c0_60 = arith.constant 0 : index
    %c0_61 = arith.constant 0 : index
    %114 = vector.load %arg12[%c0_60, %c0_61] : memref<1x128xf32, #tpu.memory_space<vmem>>, vector<1x128xf32>
    %115 = vector.broadcast %114 : vector<1x128xf32> to vector<8x128xf32>
    %116 = arith.addf %113, %115 : vector<8x128xf32>
    %c0_62 = arith.constant 0 : index
    %c0_63 = arith.constant 0 : index
    %c0_64 = arith.constant 0 : index
    %117 = vector.load %arg13[%c0_62, %c0_63, %c0_64] : memref<1x8x128xf32, #tpu.memory_space<vmem>>, vector<1x8x128xf32>
    %118 = vector.shape_cast %117 : vector<1x8x128xf32> to vector<8x128xf32>
    %119 = vector.shape_cast %116 : vector<8x128xf32> to vector<1x8x128xf32>
    tpu.vector_store %arg13[%c0_62, %c0_63, %c0_64], %119 {strides = array<i32>} : memref<1x8x128xf32, #tpu.memory_space<vmem>>, vector<1x8x128xf32>,
    return
  }
  func.func @transform_0(%arg0: i32) -> (i32, i32, i32) {
    %c0_i32 = arith.constant 0 : i32
    %c0_i32_0 = arith.constant 0 : i32
    %c0_i32_1 = arith.constant 0 : i32
    return %arg0, %c0_i32, %c0_i32_0 : i32, i32, i32
  }
  func.func @transform_1(%arg0: i32) -> (i32, i32, i32) {
    %c0_i32 = arith.constant 0 : i32
    %c0_i32_0 = arith.constant 0 : i32
    %c0_i32_1 = arith.constant 0 : i32
    return %arg0, %c0_i32, %c0_i32_0 : i32, i32, i32
  }
  func.func @transform_2(%arg0: i32) -> (i32, i32, i32) {
    %c0_i32 = arith.constant 0 : i32
    %c0_i32_0 = arith.constant 0 : i32
    %c0_i32_1 = arith.constant 0 : i32
    return %arg0, %c0_i32, %c0_i32_0 : i32, i32, i32
  }
  func.func @transform_3(%arg0: i32) -> (i32, i32, i32, i32) {
    %c0_i32 = arith.constant 0 : i32
    %c0_i32_0 = arith.constant 0 : i32
    %c0_i32_1 = arith.constant 0 : i32
    %c0_i32_2 = arith.constant 0 : i32
    return %arg0, %c0_i32, %c0_i32_0, %c0_i32_1 : i32, i32, i32, i32
  }
  func.func @transform_4(%arg0: i32) -> (i32, i32) {
    %c0_i32 = arith.constant 0 : i32
    %c0_i32_0 = arith.constant 0 : i32
    %c0_i32_1 = arith.constant 0 : i32
    return %c0_i32, %c0_i32_0 : i32, i32
  }
  func.func @transform_5(%arg0: i32) -> (i32, i32) {
    %c0_i32 = arith.constant 0 : i32
    %c0_i32_0 = arith.constant 0 : i32
    %c0_i32_1 = arith.constant 0 : i32
    return %c0_i32, %c0_i32_0 : i32, i32
  }
  func.func @transform_6(%arg0: i32) -> (i32, i32) {
    %c0_i32 = arith.constant 0 : i32
    %c0_i32_0 = arith.constant 0 : i32
    %c0_i32_1 = arith.constant 0 : i32
    return %c0_i32, %c0_i32_0 : i32, i32
  }
  func.func @transform_7(%arg0: i32) -> (i32, i32) {
    %c0_i32 = arith.constant 0 : i32
    %c0_i32_0 = arith.constant 0 : i32
    %c0_i32_1 = arith.constant 0 : i32
    return %c0_i32, %c0_i32_0 : i32, i32
  }
  func.func @transform_8(%arg0: i32) -> (i32, i32) {
    %c0_i32 = arith.constant 0 : i32
    %c0_i32_0 = arith.constant 0 : i32
    %c0_i32_1 = arith.constant 0 : i32
    return %c0_i32, %c0_i32_0 : i32, i32
  }
  func.func @transform_9(%arg0: i32) -> (i32, i32) {
    %c0_i32 = arith.constant 0 : i32
    %c0_i32_0 = arith.constant 0 : i32
    %c0_i32_1 = arith.constant 0 : i32
    return %c0_i32, %c0_i32_0 : i32, i32
  }
  func.func @transform_10(%arg0: i32) -> (i32, i32) {
    %c0_i32 = arith.constant 0 : i32
    %c0_i32_0 = arith.constant 0 : i32
    %c0_i32_1 = arith.constant 0 : i32
    return %c0_i32, %c0_i32_0 : i32, i32
  }
  func.func @transform_11(%arg0: i32) -> (i32, i32) {
    %c0_i32 = arith.constant 0 : i32
    %c0_i32_0 = arith.constant 0 : i32
    %c0_i32_1 = arith.constant 0 : i32
    return %c0_i32, %c0_i32_0 : i32, i32
  }
  func.func @transform_12(%arg0: i32) -> (i32, i32, i32) {
    %c0_i32 = arith.constant 0 : i32
    %c0_i32_0 = arith.constant 0 : i32
    %c0_i32_1 = arith.constant 0 : i32
    return %arg0, %c0_i32, %c0_i32_0 : i32, i32, i32
  }
}

</mosaic_0001>

<bundles_post_ra>
// kernel: tpu_custom_call.1
= control target key start
LH: loop header
LB: loop body
LE: loop exit
PB: predicated region body
PF: predicated region fallthrough
CT: control target
= control target key end

     0   :  { %s3553_s0 = inlined_call_operand.hbm [shape: f32[2,8,128], index: 0, kind: input, shape index: {}]   ;;  %s3554_s1 = inlined_call_operand.hbm [shape: f32[2,8,128], index: 1, kind: input, shape index: {}]   ;;  %s3555_s2 = inlined_call_operand.hbm [shape: f32[2,8,128], index: 2, kind: input, shape index: {}]   ;;  %s3556_s3 = inlined_call_operand.hbm [shape: s32[2,1,8,8], index: 3, kind: input, shape index: {}]   ;;  %s3557_s4 = inlined_call_operand.hbm [shape: f32[128,128], index: 4, kind: input, shape index: {}]   ;;  %s3558_s5 = inlined_call_operand.vmem [shape: f32[1,128], index: 5, kind: input, shape index: {}]   ;;  %s3559_s6 = inlined_call_operand.hbm [shape: f32[128,128], index: 6, kind: input, shape index: {}]   ;;  %s3560_s7 = inlined_call_operand.vmem [shape: f32[1,128], index: 7, kind: input, shape index: {}]   ;;  %s3561_s8 = inlined_call_operand.hbm [shape: f32[128,128], index: 8, kind: input, shape index: {}]   ;;  %s3562_s9 = inlined_call_operand.vmem [shape: f32[1,128], index: 9, kind: input, shape index: {}]   ;;  %s3563_s10 = inlined_call_operand.hbm [shape: f32[128,128], index: 10, kind: input, shape index: {}]   ;;  %s3564_s11 = inlined_call_operand.vmem [shape: f32[1,128], index: 11, kind: input, shape index: {}]   ;;  %s3565_s12 = inlined_call_operand.hbm [shape: f32[2,8,128], index: 12, kind: output, shape index: {}]  }
   0x1   :  { %3591 = sst [smem:[#allocation29_spill]] %s3554_s1 }
   0x2   :  { %3592 = sst [smem:[#allocation30_spill]] %s3557_s4 }
   0x3   :  { %3593 = sst [smem:[#allocation31_spill]] %s3558_s5 }
   0x4   :  { %3594 = sst [smem:[#allocation32_spill]] %s3559_s6 }
   0x5   :  { %3595 = sst [smem:[#allocation33_spill]] %s3560_s7 }
   0x6   :  { %3596 = sst [smem:[#allocation34_spill]] %s3562_s9 }
   0x7   :  { %3597 = sst [smem:[#allocation35_spill]] %s3564_s11 }
   0x8   :  { %3598 = sst [smem:[#allocation36_spill]] %s3565_s12 }
   0x9   :  { %17 = vsyncpa [#allocation3], 0 }
   0xa   :  { %19 = vsyncpa [#allocation3 + $0x1], 0 }
   0xb   :  { %20 = vsyncpa [#allocation6], 0 }
   0xc   :  { %22 = vsyncpa [#allocation6 + $0x1], 0 }
   0xd   :  { %23 = vsyncpa [#allocation9], 0 }
   0xe   :  { %25 = vsyncpa [#allocation9 + $0x1], 0 }
   0xf   :  { %26 = vsyncpa [#allocation12], 0 }
  0x10   :  { %27 = vsyncpa [#allocation15], 0 }
  0x11   :  { %28 = vsyncpa [#allocation4], 0 }
  0x12   :  { %30 = vsyncpa [#allocation4 + $0x1], 0  ;;  %s3001_s21 = smov 0   ;;  %s3003_s22 = smov 0  }
  0x13   :  { %s3005_s23 = smov 0   ;;  %s3007_s24 = smov 0  }
  0x14 LB: > { %3599 = sst [smem:[#allocation24_spill]] %s2905_s21  ;;  %s3022_s25 = sadd.s32 4294967295, %s2917_s24   ;;  %s2917_s24 = sphi %s3007_s24, %s3645_s24   ;;  %s2913_s23 = sphi %s3005_s23, %s3649_s23   ;;  %s2909_s22 = sphi %s3003_s22, %s3648_s22   ;;  %s2905_s21 = sphi %s3001_s21, %s3647_s21  }
  0x15   : > { %s2052_s26 = sadd.s32 4294967294, %s2917_s24   ;;  %p56_p0 = scmp.ne.s32.totalorder %s2909_s22, %s2905_s21 }
  0x16   : > { %p3567_p1 = scmp.eq.s32.totalorder %s3022_s25, 0  ;;  %p332_p3 = scmp.eq.s32.totalorder %s2052_s26, 1 }
  0x17   : > { %p2053_p5 = scmp.ge.s32.totalorder %s2917_s24, 1  ;;  %p339_p7 = scmp.lt.s32.totalorder %s2917_s24, 3 }
  0x18   : > { %p3031_p4 = por %p3567_p1, %p56_p0  ;;  %p3036_p6 = por %p332_p3, %p56_p0 }
  0x19   : > { %p3041_p8 = pnand %p2053_p5, %p339_p7  ;;  %s2919_s30 = smov [#allocation10]  }
  0x1a   : > { %s3600_s27 = scalar_select %p3031_p4, 1, 0 }
  0x1b   : > { %s3601_s28 = scalar_select %p3036_p6, 1, 0 }
  0x1c   : > { %s3603_s29 = scalar_select %p3041_p8, 1, 0 }
  0x1d   : > { %3602 = sst [smem:[#allocation25_spill]] %s3601_s28  ;;  %s351_s13 = sshll.u32 %s2919_s30, 4  ;;  %s3045_s13 = int_to_ptr.vmem [resolvable:$true] %s351_s13 }
  0x1e   : > { %p2499_p9 = pneg %p3041_p8  ;;  %s2920_s15 = smov [#allocation11]  }
  0x1f   : > { %s367_s16 = sshll.u32 %s2920_s15, 4  ;;  %s3605_s4 = sld [smem:[#allocation30_spill]]  ;;  %s3056_s16 = int_to_ptr.vmem [resolvable:$true] %s367_s16 }
  0x20   : > { %p3052_p11 = pnand %p2499_p9, %p3567_p1 }
  0x22   : > { %s3604_s14 = scalar_select %p3052_p11, 1, 0 }
  0x23   : > { %p3066_p13 = pneg %p3052_p11 }
  0x25   : > { %s2599_s19 = scalar_lea.hbm %s3605_s4, 2048 }
  0x26   : > { %p2600_p12 = scmp.ne.s32.totalorder %s3605_s4, %s2599_s19  ;;  %p2606_p5 = scmp.lt.u32.totalorder %s2599_s19, %s3605_s4 }
  0x27   : > { %s3606_s30 = scalar_select %p3066_p13, 1, 0 }
  0x28   : > { %p2602_p0 = pnand %p3066_p13, %p2600_p12 }
  0x2a   : > { %p2603_p3 = pneg %p2602_p0 }
  0x2c   : > { %p2608_p7 = pnand %p2606_p5, %p2603_p3 }
  0x2e   : > { %2611 = shalt.err (!%p2608_p7)
}
  0x2f   : > { %s2612_s17 = scalar_lea.vmem %s3045_s13, 2048  ;;  %p2620_p2 = scmp.lt.s32.totalorder %s3045_s13, %s3045_s13 }
  0x30   : > { %p2613_p9 = scmp.ne.s32.totalorder %s3045_s13, %s2612_s17  ;;  %p2621_p6 = scmp.lt.s32.totalorder %s2612_s17, %s2612_s17 }
  0x32   : > { %p2615_p10 = pnand %p2613_p9, %p3066_p13  ;;  %p2622_p12 = por %p2621_p6, %p2620_p2 }
  0x34   : > { %p2616_p1 = pneg %p2615_p10 }
  0x36   : > { %p2623_p0 = pnand %p2622_p12, %p2616_p1 }
  0x38   : > { %2626 = shalt.err (!%p2623_p0)
}
  0x39   : > { %s3571_s18 = smov 128   ;;  %s3573_s28 = smov 8  }
  0x3a   : > { %2502 = dma.hbm_to_vmem [thread:$0]  (!%p3052_p11), %s3605_s4, 2048, %s3045_s13, [#allocation9], %s3571_s18, %s3571_s18, %s3573_s28  }
  0x3b   : > { %s3607_s6 = sld [smem:[#allocation32_spill]] }
  0x41   : > { %s2627_s17 = scalar_lea.hbm %s3607_s6, 2048 }
  0x42   : > { %p2628_p1 = scmp.ne.s32.totalorder %s3607_s6, %s2627_s17  ;;  %p2634_p10 = scmp.lt.u32.totalorder %s2627_s17, %s3607_s6 }
  0x44   : > { %p2630_p2 = pnand %p2628_p1, %p3066_p13 }
  0x46   : > { %p2631_p6 = pneg %p2630_p2 }
  0x48   : > { %p2636_p3 = pnand %p2634_p10, %p2631_p6 }
  0x4a   : > { %2639 = shalt.err (!%p2636_p3)
}
  0x4b   : > { %s2640_s13 = scalar_lea.vmem %s3056_s16, 2048  ;;  %p2648_p12 = scmp.lt.s32.totalorder %s3056_s16, %s3056_s16 }
  0x4c   : > { %p2641_p5 = scmp.ne.s32.totalorder %s3056_s16, %s2640_s13  ;;  %p2649_p0 = scmp.lt.s32.totalorder %s2640_s13, %s2640_s13 }
  0x4e   : > { %p2643_p7 = pnand %p2641_p5, %p3066_p13  ;;  %p2650_p1 = por %p2649_p0, %p2648_p12 }
  0x50   : > { %p2644_p9 = pneg %p2643_p7 }
  0x52   : > { %p2651_p2 = pnand %p2650_p1, %p2644_p9 }
  0x54   : > { %2654 = shalt.err (!%p2651_p2)
}
  0x55   : > { %2505 = dma.hbm_to_vmem [thread:$0]  (!%p3052_p11), %s3607_s6, 2048, %s3056_s16, [#allocation12], %s3571_s18, %s3571_s18, %s3573_s28  }
  0x56   : > { %s3117_s12 = sadd.s32 1, %s2917_s24   ;;  %s43_s21 = sadd.s32 1, %s2913_s23 }
  0x57   : > { %3608 = sst [smem:[#allocation26_spill]] %s3117_s12  ;;  %s40_s19 = ssub.s32 %s2917_s24, %s3117_s12 }
  0x58   : > { %p50_p6 = scmp.ne.s32.totalorder %s2913_s23, %s2909_s22  ;;  %p41_p10 = scmp.eq.s32.totalorder %s40_s19, 0 }
  0x59   : > { %p51_p3 = scmp.eq.s32.totalorder %s2917_s24, 0  ;;  %p3609_p5 = scmp.eq.s32.totalorder %s3022_s25, 1 }
  0x5a   : > { %p2533_p9 = scmp.lt.s32.totalorder %s2917_s24, 2  ;;  %s3570_s15 = sand.u32 1, %s2913_s23  }
  0x5b   : > { %p3127_p7 = por %p3609_p5, %p50_p6  ;;  %p52_p12 = por %p51_p3, %p50_p6 }
  0x5c   : > { %s3133_s26 = scalar_select %p41_p10, %s2913_s23, %s43_s21  }
  0x5d   : > { %s3610_s20 = scalar_select %p3127_p7, 1, 0 }
  0x5e   : > { %3612 = sst [smem:[#allocation28_spill]] %s3133_s26  ;;  %s3138_s16 = sshll.u32 %s3570_s15, 3 }
  0x5f   : > { %3611 = sst [smem:[#allocation27_spill]] %s3610_s20  ;;  %s3141_s17 = sshll.u32 %s2917_s24, 7 }
  0x60   : > { %p3143_p0 = pnand %p2533_p9, %p52_p12  ;;  %s3579_s9 = sand.u32 1, %s2917_s24  }
  0x61   : > { %s3614_s1 = sld [smem:[#allocation29_spill]]  ;;  %s438_s15 = scalar_lea.vmem [#allocation5], %s3138_s16 }
  0x62   : > { %s3613_s13 = scalar_select %p3143_p0, 1, 0 }
  0x63   : > { %s445_s18 = sshll.u32 %s438_s15, 4  ;;  %s3159_s28 = scalar_lea.sflag [#allocation6], %s3579_s9  ;;  %s3155_s18 = int_to_ptr.vmem [resolvable:$true] %s445_s18 }
  0x64   : > { %p3165_p2 = pneg %p3143_p0 }
  0x66   : > { %s3615_s6 = scalar_select %p3165_p2, 1, 0 }
  0x67   : > { %s3152_s21 = scalar_lea.hbm %s3614_s1, %s3141_s17  ;;  %s2660_s15 = scalar_lea.hbm %s3614_s1, 256 }
  0x68   : > { %s2655_s4 = scalar_lea.hbm %s3152_s21, 128  ;;  %p2661_p3 = scmp.lt.u32.totalorder %s3152_s21, %s3614_s1 }
  0x69   : > { %p2656_p1 = scmp.ne.s32.totalorder %s3152_s21, %s2655_s4  ;;  %p2662_p5 = scmp.lt.u32.totalorder %s2660_s15, %s2655_s4 }
  0x6a   : > { %p2664_p12 = scmp.lt.u32.totalorder %s2655_s4, %s3152_s21 }
  0x6b   : > { %p2658_p6 = pnand %p3165_p2, %p2656_p1  ;;  %p2663_p9 = por %p2662_p5, %p2661_p3 }
  0x6d   : > { %p2659_p10 = pneg %p2658_p6  ;;  %p2665_p7 = por %p2664_p12, %p2663_p9 }
  0x6f   : > { %p2666_p4 = pnand %p2665_p7, %p2659_p10 }
  0x71   : > { %2669 = shalt.err (!%p2666_p4)
}
  0x72   : > { %s2670_s9 = scalar_lea.vmem %s3155_s18, 128  ;;  %s2923_s11 = smov [#allocation5]  }
  0x73   : > { %p2671_p1 = scmp.ne.s32.totalorder %s3155_s18, %s2670_s9  ;;  %s2675_s19 = sshll.u32 %s2923_s11, 4  ;;  %s2676_s19 = int_to_ptr.vmem [resolvable:$false] %s2675_s19 }
  0x74   : > { %s2677_s12 = scalar_lea.vmem %s2676_s19, 256  ;;  %p2678_p11 = scmp.lt.s32.totalorder %s3155_s18, %s2676_s19 }
  0x75   : > { %p2673_p6 = pnand %p2671_p1, %p3165_p2  ;;  %p2679_p13 = scmp.lt.s32.totalorder %s2677_s12, %s2670_s9 }
  0x77   : > { %p2674_p8 = pneg %p2673_p6  ;;  %p2680_p3 = por %p2679_p13, %p2678_p11 }
  0x79   : > { %p2681_p5 = pnand %p2680_p3, %p2674_p8 }
  0x7b   : > { %2684 = shalt.err (!%p2681_p5)
}
  0x7c   : > { %2518 = dma.hbm_to_vmem [thread:$0]  (!%p3143_p0), %s3152_s21, 128, %s3155_s18, %s3159_s28  }
  0x7d   : > { %s2924_s4 = smov [#allocation13]   ;;  %s2925_s15 = smov [#allocation14]  }
  0x7e   : > { %s383_s26 = sshll.u32 %s2924_s4, 4  ;;  %s399_s1 = sshll.u32 %s2925_s15, 4  ;;  %s384_s26 = int_to_ptr.vmem [resolvable:$true] %s383_s26  ;;  %s400_s1 = int_to_ptr.vmem [resolvable:$true] %s399_s1 }
  0x7f   : > { %s2685_s19 = scalar_lea.hbm %s3561_s8, 2048  ;;  %p3616_p8 = scmp.ne.s32.totalorder %s3606_s30, 0 }
  0x80   : > { %p2686_p4 = scmp.ne.s32.totalorder %s3561_s8, %s2685_s19  ;;  %p2692_p7 = scmp.lt.u32.totalorder %s2685_s19, %s3561_s8 }
  0x82   : > { %p2688_p11 = pnand %p2686_p4, %p3616_p8 }
  0x84   : > { %p2689_p13 = pneg %p2688_p11 }
  0x86   : > { %p2694_p10 = pnand %p2692_p7, %p2689_p13 }
  0x88   : > { %2697 = shalt.err (!%p2694_p10)
}
  0x89   : > { %s2698_s18 = scalar_lea.vmem %s384_s26, 2048  ;;  %p2706_p6 = scmp.lt.s32.totalorder %s384_s26, %s384_s26 }
  0x8a   : > { %p2699_p9 = scmp.ne.s32.totalorder %s384_s26, %s2698_s18  ;;  %p2707_p3 = scmp.lt.s32.totalorder %s2698_s18, %s2698_s18 }
  0x8c   : > { %p2701_p12 = pnand %p2699_p9, %p3616_p8  ;;  %p2708_p5 = por %p2707_p3, %p2706_p6 }
  0x8e   : > { %p2702_p1 = pneg %p2701_p12 }
  0x90   : > { %p2709_p0 = pnand %p2708_p5, %p2702_p1 }
  0x92   : > { %2712 = shalt.err (!%p2709_p0)
}
  0x93   : > { %p3617_p4 = scmp.ne.s32.totalorder %s3604_s14, 0  ;;  %s3618_s20 = smov 8  }
  0x94   : > { %s3619_s21 = smov 128   ;;  %s2713_s11 = scalar_lea.hbm %s3563_s10, 2048 }
  0x95   : > { %2508 = dma.hbm_to_vmem [thread:$0]  (!%p3617_p4), %s3561_s8, 2048, %s384_s26, [#allocation12], %s3619_s21, %s3619_s21, %s3618_s20  }
  0x96   : > { %p2714_p11 = scmp.ne.s32.totalorder %s3563_s10, %s2713_s11  ;;  %p2720_p7 = scmp.lt.u32.totalorder %s2713_s11, %s3563_s10 }
  0x98   : > { %p2716_p0 = pnand %p2714_p11, %p3616_p8 }
  0x9a   : > { %p2717_p13 = pneg %p2716_p0 }
  0x9c   : > { %p2722_p10 = pnand %p2720_p7, %p2717_p13 }
  0x9e   : > { %2725 = shalt.err (!%p2722_p10)
}
  0x9f   : > { %s2726_s5 = scalar_lea.vmem %s400_s1, 2048  ;;  %p2734_p6 = scmp.lt.s32.totalorder %s400_s1, %s400_s1 }
  0xa0   : > { %p2727_p9 = scmp.ne.s32.totalorder %s400_s1, %s2726_s5  ;;  %p2735_p3 = scmp.lt.s32.totalorder %s2726_s5, %s2726_s5 }
  0xa2   : > { %p2729_p12 = pnand %p2727_p9, %p3616_p8  ;;  %p2736_p5 = por %p2735_p3, %p2734_p6 }
  0xa4   : > { %p2730_p1 = pneg %p2729_p12 }
  0xa6   : > { %p2737_p2 = pnand %p2736_p5, %p2730_p1 }
  0xa8   : > { %2740 = shalt.err (!%p2737_p2)
}
  0xa9   : > { %2511 = dma.hbm_to_vmem [thread:$0]  (!%p3617_p4), %s3563_s10, 2048, %s400_s1, [#allocation15], %s3619_s21, %s3619_s21, %s3618_s20  }
  0xaa   : > { %s3235_s15 = scalar_lea.hbm %s3553_s0, %s3141_s17  ;;  %s420_s14 = scalar_lea.vmem [#allocation2], %s3138_s16 }
  0xab   : > { %s427_s11 = sshll.u32 %s420_s14, 4  ;;  %s3244_s12 = scalar_lea.hbm %s3555_s2, %s3141_s17  ;;  %s3238_s11 = int_to_ptr.vmem [resolvable:$true] %s427_s11 }
  0xac   : > { %s3620_s18 = sand.u32 1, %s2913_s23   ;;  %s2741_s20 = scalar_lea.hbm %s3235_s15, 128 }
  0xad   : > { %s417_s1 = scalar_lea.sflag [#allocation3], %s3620_s18  ;;  %p2742_p2 = scmp.ne.s32.totalorder %s3235_s15, %s2741_s20 }
  0xae   : > { %p3621_p8 = scmp.ne.s32.totalorder %s3615_s6, 0  ;;  %s2746_s26 = scalar_lea.hbm %s3553_s0, 256 }
  0xaf   : > { %p2747_p0 = scmp.lt.u32.totalorder %s3235_s15, %s3553_s0  ;;  %p2748_p13 = scmp.lt.u32.totalorder %s2746_s26, %s2741_s20 }
  0xb0   : > { %p2744_p4 = pnand %p2742_p2, %p3621_p8  ;;  %p2750_p10 = scmp.lt.u32.totalorder %s2741_s20, %s3235_s15 }
  0xb1   : > { %p2749_p7 = por %p2748_p13, %p2747_p0 }
  0xb2   : > { %p2745_p11 = pneg %p2744_p4 }
  0xb3   : > { %p2751_p9 = por %p2750_p10, %p2749_p7 }
  0xb5   : > { %p2752_p12 = pnand %p2751_p9, %p2745_p11 }
  0xb7   : > { %2755 = shalt.err (!%p2752_p12)
}
  0xb8   : > { %s2756_s4 = scalar_lea.vmem %s3238_s11, 128  ;;  %s2926_s14 = smov [#allocation2]  }
  0xb9   : > { %p2757_p1 = scmp.ne.s32.totalorder %s3238_s11, %s2756_s4  ;;  %s2761_s19 = sshll.u32 %s2926_s14, 4  ;;  %s2762_s19 = int_to_ptr.vmem [resolvable:$false] %s2761_s19 }
  0xba   : > { %s2763_s9 = scalar_lea.vmem %s2762_s19, 256  ;;  %p2764_p5 = scmp.lt.s32.totalorder %s3238_s11, %s2762_s19 }
  0xbb   : > { %p2759_p6 = pnand %p2757_p1, %p3621_p8  ;;  %p2765_p2 = scmp.lt.s32.totalorder %s2763_s9, %s2756_s4 }
  0xbd   : > { %p2760_p3 = pneg %p2759_p6  ;;  %p2766_p4 = por %p2765_p2, %p2764_p5 }
  0xbf   : > { %p2767_p0 = pnand %p2766_p4, %p2760_p3 }
  0xc1   : > { %2770 = shalt.err (!%p2767_p0)
}
  0xc2   : > { %p3622_p11 = scmp.ne.s32.totalorder %s3613_s13, 0  ;;  %s456_s18 = scalar_lea.vmem [#allocation7], %s3138_s16 }
  0xc3   : > { %s463_s20 = sshll.u32 %s456_s18, 4  ;;  %s3274_s26 = scalar_lea.hbm %s3556_s3, %s3141_s17  ;;  %s464_s20 = int_to_ptr.vmem [resolvable:$true] %s463_s20 }
  0xc4   : > { %2515 = dma.hbm_to_vmem [thread:$0]  (!%p3622_p11), %s3235_s15, 128, %s3238_s11, %s417_s1  }
  0xc5   : > { %s2771_s7 = scalar_lea.hbm %s3244_s12, 128  ;;  %s2776_s14 = scalar_lea.hbm %s3555_s2, 256 }
  0xc6   : > { %p2772_p13 = scmp.ne.s32.totalorder %s3244_s12, %s2771_s7  ;;  %p2777_p9 = scmp.lt.u32.totalorder %s3244_s12, %s3555_s2 }
  0xc7   : > { %p2778_p12 = scmp.lt.u32.totalorder %s2776_s14, %s2771_s7  ;;  %p2780_p6 = scmp.lt.u32.totalorder %s2771_s7, %s3244_s12 }
  0xc8   : > { %p2774_p7 = pnand %p2772_p13, %p3621_p8 }
  0xc9   : > { %p2779_p1 = por %p2778_p12, %p2777_p9 }
  0xca   : > { %p2775_p10 = pneg %p2774_p7 }
  0xcb   : > { %p2781_p3 = por %p2780_p6, %p2779_p1 }
  0xcd   : > { %p2782_p5 = pnand %p2781_p3, %p2775_p10 }
  0xcf   : > { %2785 = shalt.err (!%p2782_p5)
}
  0xd0   : > { %s2786_s17 = scalar_lea.vmem %s464_s20, 128  ;;  %s2927_s15 = smov [#allocation7]  }
  0xd1   : > { %p2787_p2 = scmp.ne.s32.totalorder %s464_s20, %s2786_s17  ;;  %s2791_s11 = sshll.u32 %s2927_s15, 4  ;;  %s2792_s11 = int_to_ptr.vmem [resolvable:$false] %s2791_s11 }
  0xd2   : > { %s2793_s1 = scalar_lea.vmem %s2792_s11, 256  ;;  %p2794_p13 = scmp.lt.s32.totalorder %s464_s20, %s2792_s11 }
  0xd3   : > { %p2789_p4 = pnand %p2787_p2, %p3621_p8  ;;  %p2795_p7 = scmp.lt.s32.totalorder %s2793_s1, %s2786_s17 }
  0xd5   : > { %p2790_p0 = pneg %p2789_p4  ;;  %p2796_p11 = por %p2795_p7, %p2794_p13 }
  0xd7   : > { %p2797_p9 = pnand %p2796_p11, %p2790_p0 }
  0xd9   : > { %2800 = shalt.err (!%p2797_p9)
}
  0xda   : > { %p3623_p12 = scmp.ne.s32.totalorder %s3613_s13, 0  ;;  %s474_s18 = scalar_lea.vmem [#allocation8], %s3138_s16 }
  0xdb   : > { %s481_s21 = sshll.u32 %s474_s18, 4  ;;  %s3624_s5 = sand.u32 1, %s2917_s24   ;;  %s482_s21 = int_to_ptr.vmem [resolvable:$true] %s481_s21 }
  0xdc   : > { %2521 = dma.hbm_to_vmem [thread:$0]  (!%p3623_p12), %s3244_s12, 128, %s464_s20, %s3159_s28  }
  0xdd   : > { %s471_s7 = scalar_lea.sflag [#allocation9], %s3624_s5  ;;  %s2801_s30 = scalar_lea.hbm %s3274_s26, 128 }
  0xde   : > { %p2802_p11 = scmp.ne.s32.totalorder %s3274_s26, %s2801_s30  ;;  %s2806_s19 = scalar_lea.hbm %s3556_s3, 256 }
  0xdf   : > { %p2807_p6 = scmp.lt.u32.totalorder %s3274_s26, %s3556_s3  ;;  %p2808_p3 = scmp.lt.u32.totalorder %s2806_s19, %s2801_s30 }
  0xe0   : > { %p2804_p10 = pnand %p2802_p11, %p3621_p8  ;;  %p2810_p2 = scmp.lt.u32.totalorder %s2801_s30, %s3274_s26 }
  0xe1   : > { %p2809_p5 = por %p2808_p3, %p2807_p6 }
  0xe2   : > { %p2805_p1 = pneg %p2804_p10 }
  0xe3   : > { %p2811_p4 = por %p2810_p2, %p2809_p5 }
  0xe5   : > { %p2812_p0 = pnand %p2811_p4, %p2805_p1 }
  0xe7   : > { %2815 = shalt.err (!%p2812_p0)
}
  0xe8   : > { %s2816_s28 = scalar_lea.vmem %s482_s21, 128  ;;  %s2928_s16 = smov [#allocation8]  }
  0xe9   : > { %p2817_p13 = scmp.ne.s32.totalorder %s482_s21, %s2816_s28  ;;  %s2821_s12 = sshll.u32 %s2928_s16, 4  ;;  %s2822_s12 = int_to_ptr.vmem [resolvable:$false] %s2821_s12 }
  0xea   : > { %s2823_s20 = scalar_lea.vmem %s2822_s12, 256  ;;  %p2824_p11 = scmp.lt.s32.totalorder %s482_s21, %s2822_s12 }
  0xeb   : > { %p2819_p7 = pnand %p2817_p13, %p3621_p8  ;;  %p2825_p10 = scmp.lt.s32.totalorder %s2823_s20, %s2816_s28 }
  0xed   : > { %p2820_p9 = pneg %p2819_p7  ;;  %p2826_p12 = por %p2825_p10, %p2824_p11 }
  0xef   : > { %p2827_p3 = pnand %p2826_p12, %p2820_p9 }
  0xf1   : > { %2830 = shalt.err (!%p2827_p3)
}
  0xf2   : > { %p3625_p6 = scmp.ne.s32.totalorder %s3613_s13, 0  ;;  %p3626_p1 = scmp.ne.s32.totalorder %s3603_s29, 0 }
  0xf3   : > { %s3317_s6 = sand.u32 (!%p3626_p1), 1, %s2909_s22   ;;  %p3627_p8 = scmp.ne.s32.totalorder (!%p3626_p1), %s3600_s27, 0 }
  0xf4   : > { %2524 = dma.hbm_to_vmem [thread:$0]  (!%p3625_p6), %s3274_s26, 128, %s482_s21, %s471_s7  }
  0xf5   : > { %490 = sbr.rel (%p3626_p1) target bundleno = 3315 (0xcf3), region = 68  ;;  %s3320_s15 = sshll.u32 (!%p3626_p1), %s3317_s6, 3 }
  0xf6   : > { %s493_s11 = scalar_lea.sflag (!%p3626_p1), [#allocation3], %s3317_s6  ;;  %s496_s1 = scalar_lea.vmem (!%p3626_p1), [#allocation2], %s3320_s15 }
  0xfc   : > { %2876 = dma.done.wait (%p3627_p8), %s493_s11, 128  }
  0xfd   : > { %2878 = vsyncadd (%p3627_p8), %s493_s11, 4294967168  ;;  %s501_s29 = sand.u32 1, %s3022_s25   ;;  %s505_s26 = scalar_lea.vmem [#allocation5], %s3320_s15 }
  0xfe   : > { %s502_s13 = scalar_lea.sflag [#allocation6], %s501_s29 }
  0xff   : > { %2880 = dma.done.wait (%p3627_p8), %s502_s13, 256  }
 0x100   : > { %2882 = vsyncadd (%p3627_p8), %s502_s13, 4294967040  ;;  %s514_s18 = scalar_lea.vmem [#allocation7], %s3320_s15  ;;  %s520_s21 = scalar_lea.sflag [#allocation9], %s501_s29 }
 0x101   : > { %s523_s5 = scalar_lea.vmem [#allocation8], %s3320_s15 }
 0x102   : > { %2884 = dma.done.wait (%p3627_p8), %s520_s21, 128  }
 0x103   : > { %2886 = vsyncadd (%p3627_p8), %s520_s21, 4294967168  ;;  %p3628_p12 = scmp.eq.s32.totalorder %s3022_s25, 0 }
 0x105   : > { %2888 = dma.done.wait (%p3628_p12), [#allocation9], 2048   ;;  %p3629_p5 = pmov %p3628_p12 }
 0x107   : > { %2890 = vsyncadd (%p3629_p5), [#allocation9], 4294965248  ;;  %p3630_p2 = pmov %p3629_p5 }
 0x109   : > { %2892 = dma.done.wait (%p3630_p2), [#allocation12], 4096   ;;  %p3631_p4 = pmov %p3630_p2 }
 0x10a   : > { %p3632_p0 = pmov %p3630_p2 }
 0x10b   : > { %2894 = vsyncadd (%p3631_p4), [#allocation12], 4294963200 }
 0x10c   : > { %2896 = dma.done.wait (%p3632_p0), [#allocation15], 2048   ;;  %p3633_p13 = pmov %p3632_p0 }
 0x10d   : > { %v2929_v0 = vmov 0.0|0.0   ;;  %vm2930_vm0 = vmmov 0   ;;  %v2931_v1 = vmov 0.0   ;;  %v693_v2 = vld [vmem:[#allocation11] sm:$0xff]  ;;  %v694_v3 = vld [vmem:[#allocation11 + $0x8] sm:$0xff]  ;;  %v695_v7 = vld [vmem:[#allocation11 + $0x10] sm:$0xff] }
 0x10e   : > { %2898 = vsyncadd (%p3633_p13), [#allocation15], 4294965248  ;;  %2401 = vmatprep.subr.bf16.mxu1 %v2929_v0  ;;  %2377 = vmatprep.subr.bf16.mxu0 %v2929_v0  ;;  %v600_v4 = vld [vmem:[#allocation10] sm:$0xff]  ;;  %v2402_v5 = vpack.c.bf16 %v694_v3, %v693_v2  ;;  %v601_v6 = vld [vmem:[#allocation10 + $0x8] sm:$0xff]  ;;  %s3634_s30 = sld [smem:[#allocation33_spill]]  ;;  %s3635_s19 = sld [smem:[#allocation31_spill]] }
 0x10f   : > { %2255 = vmatprep.mubr.msk.f32.mxu1 %vm2930_vm0, %v2931_v1  ;;  %2220 = vmatprep.mubr.msk.f32.mxu0 %vm2930_vm0, %v2931_v1  ;;  %v696_v8 = vld [vmem:[#allocation11 + $0x18] sm:$0xff]  ;;  %v2378_v9 = vpack.c.bf16 %v601_v6, %v600_v4  ;;  %v602_v10 = vld [vmem:[#allocation10 + $0x10] sm:$0xff]  ;;  %v697_v14 = vld [vmem:[#allocation11 + $0x20] sm:$0xff]  ;;  %vm879_vm1 = vcmask 261120   ;;  %s2932_s9 = smov 96   ;;  %vm958_vm3 = vcmask 64512  }
 0x110   : > { %v603_v11 = vld [vmem:[#allocation10 + $0x18] sm:$0xff]  ;;  %2403 = vmatpush3.bf16.msra.mxu1 %v2402_v5  ;;  %v2405_v12 = vpack.c.bf16 %v696_v8, %v695_v7  ;;  %v698_v15 = vld [vmem:[#allocation11 + $0x28] sm:$0xff]  ;;  %v604_v16 = vld [vmem:[#allocation10 + $0x20] sm:$0xff]  ;;  %s3636_s16 = sld [smem:[#allocation34_spill]]  ;;  %s2933_s12 = smov 64  }
 0x111   : > { %2379 = vmatpush3.bf16.msra.mxu0 %v2378_v9  ;;  %2404 = vmatprep.subr.bf16.mxu1 %v2929_v0  ;;  %v2381_v13 = vpack.c.bf16 %v603_v11, %v602_v10  ;;  %v605_v17 = vld [vmem:[#allocation10 + $0x28] sm:$0xff]  ;;  %v2408_v18 = vpack.c.bf16 %v698_v15, %v697_v14  ;;  %v699_v20 = vld [vmem:[#allocation11 + $0x30] sm:$0xff]  ;;  %v700_v21 = vld [vmem:[#allocation11 + $0x38] sm:$0xff]  ;;  %s2934_s20 = smov 32   ;;  %s3637_s11 = sld [smem:[#allocation27_spill]] }
 0x112   : > { %2380 = vmatprep.subr.bf16.mxu0 %v2929_v0  ;;  %v2384_v19 = vpack.c.bf16 %v605_v17, %v604_v16  ;;  %v606_v22 = vld [vmem:[#allocation10 + $0x30] sm:$0xff]  ;;  %v607_v23 = vld [vmem:[#allocation10 + $0x38] sm:$0xff]  ;;  %v2411_v24 = vpack.c.bf16 %v700_v21, %v699_v20  ;;  %v701_v26 = vld [vmem:[#allocation11 + $0x40] sm:$0xff]  ;;  %s3638_s13 = sld [smem:[#allocation35_spill]]  ;;  %s3639_s7 = sld [smem:[#allocation36_spill]] }
 0x113   : > { %v2387_v25 = vpack.c.bf16 %v607_v23, %v606_v22  ;;  %v702_v27 = vld [vmem:[#allocation11 + $0x48] sm:$0xff]  ;;  %v608_v28 = vld [vmem:[#allocation10 + $0x40] sm:$0xff]  ;;  %v703_v32 = vld [vmem:[#allocation11 + $0x50] sm:$0xff]  ;;  %s1865_s4 = scalar_lea.sflag [#allocation4], %s3317_s6 }
 0x114   : > { %2406 = vmatpush3.bf16.msra.mxu1 %v2405_v12  ;;  %v609_v29 = vld [vmem:[#allocation10 + $0x48] sm:$0xff]  ;;  %v2414_v30 = vpack.c.bf16 %v702_v27, %v701_v26  ;;  %v704_v33 = vld [vmem:[#allocation11 + $0x58] sm:$0xff]  ;;  %v610_v34 = vld [vmem:[#allocation10 + $0x50] sm:$0xff] }
 0x115   : > { %2382 = vmatpush3.bf16.msra.mxu0 %v2381_v13  ;;  %2407 = vmatprep.subr.bf16.mxu1 %v2929_v0  ;;  %v2390_v31 = vpack.c.bf16 %v609_v29, %v608_v28  ;;  %v611_v35 = vld [vmem:[#allocation10 + $0x58] sm:$0xff]  ;;  %v2417_v36 = vpack.c.bf16 %v704_v33, %v703_v32  ;;  %v705_v38 = vld [vmem:[#allocation11 + $0x60] sm:$0xff]  ;;  %v706_v39 = vld [vmem:[#allocation11 + $0x68] sm:$0xff] }
 0x116   : > { %2383 = vmatprep.subr.bf16.mxu0 %v2929_v0  ;;  %v2393_v37 = vpack.c.bf16 %v611_v35, %v610_v34  ;;  %v612_v40 = vld [vmem:[#allocation10 + $0x60] sm:$0xff]  ;;  %v613_v41 = vld [vmem:[#allocation10 + $0x68] sm:$0xff]  ;;  %v2420_v42 = vpack.c.bf16 %v706_v39, %v705_v38  ;;  %v707_v44 = vld [vmem:[#allocation11 + $0x70] sm:$0xff] }
 0x117   : > { %v2396_v43 = vpack.c.bf16 %v613_v41, %v612_v40  ;;  %v708_v45 = vld [vmem:[#allocation11 + $0x78] sm:$0xff]  ;;  %v614_v46 = vld [vmem:[#allocation10 + $0x70] sm:$0xff]  ;;  %v595_v51 = vld [vmem:[%s496_s1] sm:$0xff]  ;;  %p3640_p9 = scmp.ne.s32.totalorder %s3637_s11, 0 }
 0x118   : > { %2409 = vmatpush3.bf16.msra.mxu1 %v2408_v18  ;;  %v615_v47 = vld [vmem:[#allocation10 + $0x78] sm:$0xff]  ;;  %v2423_v48 = vpack.c.bf16 %v708_v45, %v707_v44  ;;  %v2078_v52 = vld [vmem:[%s3634_s30] ss:$0 sm:$0xff]  ;;  %v787_v61 = vld [vmem:[#allocation13 + $0x8] sm:$0xff] }
 0x119   : > { %2385 = vmatpush3.bf16.msra.mxu0 %v2384_v19  ;;  %2410 = vmatprep.subr.bf16.mxu1 %v2929_v0  ;;  %v2399_v49 = vpack.c.bf16 %v615_v47, %v614_v46  ;;  %v596_v50 = vld [vmem:[%s505_s26] sm:$0xff]  ;;  %v2077_v53 = vld [vmem:[%s3635_s19] ss:$0 sm:$0xff]  ;;  %v791_v5 = vld [vmem:[#allocation13 + $0x28] sm:$0xff]  ;;  %s2098_s26 = sshll.u32 %s3022_s25, 7  ;;  %s2935_s25 = smov [#allocation16]  }
 0x11a   : > { %2386 = vmatprep.subr.bf16.mxu0 %v2929_v0  ;;  %v786_v60 = vld [vmem:[#allocation13] sm:$0xff]  ;;  %v788_v62 = vld [vmem:[#allocation13 + $0x10] sm:$0xff]  ;;  %v789_v2 = vld [vmem:[#allocation13 + $0x18] sm:$0xff]  ;;  %s3509_s30 = scalar_lea.hbm %s3639_s7, %s2098_s26 }
 0x11b   : > { %v2426_v63 = vpack.c.bf16 %v787_v61, %v786_v60  ;;  %v2429_v3 = vpack.c.bf16 %v789_v2, %v788_v62  ;;  %v790_v4 = vld [vmem:[#allocation13 + $0x20] sm:$0xff]  ;;  %v792_v7 = vld [vmem:[#allocation13 + $0x30] sm:$0xff]  ;;  %v793_v8 = vld [vmem:[#allocation13 + $0x38] sm:$0xff] }
 0x11c   : > { %2412 = vmatpush3.bf16.msra.mxu1 %v2411_v24  ;;  %v2432_v6 = vpack.c.bf16 %v791_v5, %v790_v4  ;;  %v2435_v9 = vpack.c.bf16 %v793_v8, %v792_v7  ;;  %v794_v10 = vld [vmem:[#allocation13 + $0x40] sm:$0xff]  ;;  %v795_v11 = vld [vmem:[#allocation13 + $0x48] sm:$0xff]  ;;  %v796_v13 = vld [vmem:[#allocation13 + $0x50] sm:$0xff] }
 0x11d   : > { %2388 = vmatpush3.bf16.msra.mxu0 %v2387_v25  ;;  %2413 = vmatprep.subr.bf16.mxu1 %v2929_v0  ;;  %v2438_v12 = vpack.c.bf16 %v795_v11, %v794_v10  ;;  %v797_v14 = vld [vmem:[#allocation13 + $0x58] sm:$0xff]  ;;  %v798_v16 = vld [vmem:[#allocation13 + $0x60] sm:$0xff]  ;;  %v799_v17 = vld [vmem:[#allocation13 + $0x68] sm:$0xff] }
 0x11e   : > { %2389 = vmatprep.subr.bf16.mxu0 %v2929_v0  ;;  %v2441_v15 = vpack.c.bf16 %v797_v14, %v796_v13  ;;  %v2444_v18 = vpack.c.bf16 %v799_v17, %v798_v16  ;;  %v800_v19 = vld [vmem:[#allocation13 + $0x70] sm:$0xff]  ;;  %v801_v20 = vld [vmem:[#allocation13 + $0x78] sm:$0xff]  ;;  %v597_v22 = vld [vmem:[%s514_s18] sm:$0xff]  ;;  %s594_s18 = scalar_lea.vmem [#allocation16], %s3320_s15  ;;  %s2835_s15 = sshll.u32 %s2935_s25, 4  ;;  %s2836_s15 = int_to_ptr.vmem [resolvable:$false] %s2835_s15 }
 0x11f   : > { %v2447_v21 = vpack.c.bf16 %v801_v20, %v800_v19  ;;  %v3417_v23 = vld [vmem:[%s523_s5] sm:$0xff]  ;;  %v2079_v34 = vld [vmem:[%s3636_s16] ss:$0 sm:$0xff]  ;;  %v1216_v60 = vld [vmem:[#allocation14 + $0x28] sm:$0xff]  ;;  %s1878_s21 = sshll.u32 %s594_s18, 4  ;;  %s2837_s19 = scalar_lea.vmem %s2836_s15, 256  ;;  %s3511_s21 = int_to_ptr.vmem [resolvable:$true] %s1878_s21 }
 0x120   : > { %2415 = vmatpush3.bf16.msra.mxu1 %v2414_v30  ;;  %vm599_vm2 = vcmp.eq.s32.totalorder %v3417_v23, 0  ;;  %v1217_v2 = vld [vmem:[#allocation14 + $0x30] sm:$0xff]  ;;  %v1044_v5 = vld [vmem:[#allocation14 + $0x8] sm:$0xff]  ;;  %v1046_v8 = vld [vmem:[#allocation14 + $0x18] sm:$0xff]  ;;  %s2831_s14 = scalar_lea.vmem %s3511_s21, 128  ;;  %p2838_p3 = scmp.lt.s32.totalorder %s3511_s21, %s2836_s15 }
 0x121   : > { %2391 = vmatpush3.bf16.msra.mxu0 %v2390_v31  ;;  %2416 = vmatprep.subr.bf16.mxu1 %v2929_v0  ;;  %v1045_v7 = vld [vmem:[#allocation14 + $0x10] sm:$0xff]  ;;  %p2832_p7 = scmp.ne.s32.totalorder %s3511_s21, %s2831_s14  ;;  %p2839_p6 = scmp.lt.s32.totalorder %s2837_s19, %s2831_s14 }
 0x122   : > { %2392 = vmatprep.subr.bf16.mxu0 %v2929_v0  ;;  %v2459_v11 = vpack.c.bf16 %v1046_v8, %v1045_v7  ;;  %v1779_v23 = vld [vmem:[#allocation14 + $0x70] sm:$0xff] }
 0x123   : > { %p2833_p11 = pnand %p2832_p7, %p3640_p9  ;;  %p2840_p1 = por %p2839_p6, %p2838_p3 }
 0x124   : > { %2418 = vmatpush3.bf16.msra.mxu1 %v2417_v36 }
 0x125   : > { %2394 = vmatpush3.bf16.msra.mxu0 %v2393_v37  ;;  %2419 = vmatprep.subr.bf16.mxu1 %v2929_v0  ;;  %p2834_p10 = pneg %p2833_p11 }
 0x126   : > { %2395 = vmatprep.subr.bf16.mxu0 %v2929_v0 }
 0x127   : > { %p2841_p8 = pnand %p2840_p1, %p2834_p10 }
 0x128   : > { %2421 = vmatpush3.bf16.msra.mxu1 %v2420_v42 }
 0x129   : > { %2397 = vmatpush3.bf16.msra.mxu0 %v2396_v43  ;;  %2422 = vmatprep.subr.bf16.mxu1 %v2929_v0 }
 0x12a   : > { %2398 = vmatprep.subr.bf16.mxu0 %v2929_v0 }
 0x12c   : > { %2424 = vmatpush3.bf16.msra.mxu1 %v2423_v48 }
 0x12d   : > { %2400 = vmatpush3.bf16.msra.mxu0 %v2399_v49  ;;  %2293 = vmatprep.subr.mxu1 %v2931_v1 }
 0x12e   : > { %2425 = vmatprep.subr.bf16.mxu0 %v2929_v0 }
 0x12f   : > { %2256 = vmatmul.mubr.f32.vlgmr.msra.gmra.mrb[0].mxu1 %v596_v50 }
 0x130   : > { %2221 = vmatmul.mubr.f32.vlgmr.msra.gmra.mrb[0].mxu0 %v595_v51  ;;  %2295 = vmatprep.mubr.msk.f32.mxu1 %vm2930_vm0, %v2931_v1 }
 0x131   : > { %2290 = vmatprep.mubr.msk.f32.mxu0 %vm2930_vm0, %v2931_v1  ;;  %2427 = vmatpush3.bf16.msra.mxu0 %v2426_v63 }
 0x132   : > { %2428 = vmatprep.subr.bf16.mxu0 %v2929_v0 }
 0x135   : > { %2430 = vmatpush3.bf16.msra.mxu0 %v2429_v3  ;;  %v1218_v3 = vld [vmem:[#allocation14 + $0x38] sm:$0xff] }
 0x136   : > { %2431 = vmatprep.subr.bf16.mxu0 %v2929_v0  ;;  %v2453_v4 = vpack.c.bf16 %v1218_v3, %v1217_v2 }
 0x139   : > { %2433 = vmatpush3.bf16.msra.mxu0 %v2432_v6 }
 0x13a   : > { %2434 = vmatprep.subr.bf16.mxu0 %v2929_v0 }
 0x13d   : > { %2436 = vmatpush3.bf16.msra.mxu0 %v2435_v9 }
 0x13e   : > { %2437 = vmatprep.subr.bf16.mxu0 %v2929_v0 }
 0x141   : > { %2439 = vmatpush3.bf16.msra.mxu0 %v2438_v12 }
 0x142   : > { %2440 = vmatprep.subr.bf16.mxu0 %v2929_v0 }
 0x145   : > { %2442 = vmatpush3.bf16.msra.mxu0 %v2441_v15 }
 0x146   : > { %2443 = vmatprep.subr.bf16.mxu0 %v2929_v0 }
 0x149   : > { %2445 = vmatpush3.bf16.msra.mxu0 %v2444_v18 }
 0x14a   : > { %2446 = vmatprep.subr.bf16.mxu0 %v2929_v0 }
 0x14d   : > { %2448 = vmatpush3.bf16.msra.mxu0 %v2447_v21 }
 0x14e   : > { %2461 = vmatprep.subr.bf16.mxu0 %v2929_v0 }
 0x150   : > { %2291 = vmatmul.mubr.f32.vlgmr.msra.gmra.mrb[2].mxu0 %v597_v22 }
 0x151   : > { %2353 = vmatprep.mubr.msk.f32.mxu0 %vm2930_vm0, %v2931_v1 }
 0x202   : > { %v782_v54 = vpop.f32.mrb[0].mxu1 }
 0x203   : > { %v3388_v55 = vadd.f32 %v2078_v52, %v782_v54  ;;  %v2257_v56 = vpop.f32.mrb[1].mxu1  ;;  %v689_v57 = vpop.f32.mrb[0].mxu0 }
 0x204   : > { %v3390_v58 = vadd.f32 %v2077_v53, %v689_v57  ;;  %v2222_v59 = vpop.f32.mrb[1].mxu0 }
 0x205   : > { %1049 = vrot.lane.b32.xlu1 %v3388_v55, %s2932_s9  ;;  %2294 = vmatpush3.xpose.msk.msra.mxu1 %vm879_vm1, %v3388_v55  ;;  %v1215_v59 = vld [vmem:[#allocation14 + $0x20] sm:$0xff] }
 0x206   : > { %2298 = vmatprep.subr.mxu1 %v2931_v1  ;;  %v2450_v62 = vpack.c.bf16 %v1216_v60, %v1215_v59  ;;  %v1780_v59 = vld [vmem:[#allocation14 + $0x78] sm:$0xff] }
 0x207   : > { %v2471_v60 = vpack.c.bf16 %v1780_v59, %v1779_v23 }
 0x208   : > { %2296 = vmatmul.mubr.msk.f32.vlgmr.msra.gmra.mrb[2].mxu1 %vm879_vm1, %v3390_v58 }
 0x209   : > { %1047 = vrot.lane.b32.xlu1 %v3390_v58, %s2932_s9  ;;  %2300 = vmatprep.mubr.msk.f32.mxu1 %vm2930_vm0, %v2931_v1 }
 0x223   : > { %v875_v35 = vpop.f32.mrb[2].mxu0 }
 0x224   : > { %v3427_v36 = vadd.f32 %v2079_v34, %v875_v35  ;;  %v2292_v37 = vpop.f32.mrb[3].mxu0  ;;  %v1535_v35 = vld [vmem:[#allocation14 + $0x58] sm:$0xff] }
 0x226   : > { %2299 = vmatpush3.msra.mxu1 %v3427_v36 }
 0x227   : > { %2303 = vmatprep.subr.mxu1 %v2931_v1 }
 0x277   : > { %v1050_v40 = vpop.permute.xlu1 %1049 }
 0x27b   : > { %v1048_v42 = vpop.permute.xlu1 %1047 }
 0x2db   : > { %v952_v24 = vpop.f32.mrb[2].mxu1 }
 0x2dc   : > { %v956_v25 = vmul.f32 0.17677669, %v952_v24  ;;  %v2297_v26 = vpop.f32.mrb[3].mxu1 }
 0x2de   : > { %v957_v27 = vsel %vm599_vm2, -1e+09, %v956_v25 }
 0x2df   : > { %v959_v28 = vsel %vm958_vm3, %v957_v27, -inf }
 0x2e0   : > { %960 = vmax.xlane.f32.xlu0 %v959_v28 }
 0x36d   : > { %v961_v29 = vpop.xlane.xlu0 %960 }
 0x36e   : > { %v962_v30 = vsub.f32 %v957_v27, %v961_v29 }
 0x370   : > { %v963_v31 = vmul.f32 1.442695, %v962_v30 }
 0x372   : > { %2583 = vpow2.f32 %v963_v31  ;;  %v1532_v31 = vld [vmem:[#allocation14 + $0x40] sm:$0xff] }
 0x37c   : > { %v2584_v32 = vpop.eup %2583 }
 0x37d   : > { %v965_v33 = vsel %vm958_vm3, %v2584_v32, 0.0 }
 0x37e   : > { %966 = vadd.xlane.f32.xlu0 %v965_v33  ;;  %v1534_v33 = vld [vmem:[#allocation14 + $0x50] sm:$0xff] }
 0x37f   : > { %v2465_v37 = vpack.c.bf16 %v1535_v35, %v1534_v33 }
 0x40b   : > { %v967_v38 = vpop.xlane.xlu0 %966 }
 0x40c   : > { %2585 = vrcp.f32 %v967_v38 }
 0x416   : > { %v2586_v39 = vpop.eup %2585 }
 0x417   : > { %v969_v41 = vmul.f32 %v2586_v39, %v2584_v32  ;;  %v1533_v32 = vld [vmem:[#allocation14 + $0x48] sm:$0xff] }
 0x418   : > { %v2462_v34 = vpack.c.bf16 %v1533_v32, %v1532_v31 }
 0x419   : > { %2301 = vmatmul.mubr.msk.f32.vlgmr.msra.gmra.mrb[4].mxu1 %vm958_vm3, %v969_v41 }
 0x41a   : > { %2304 = vmatpush3.xpose.msk.msra.mxu1 %vm879_vm1, %v1050_v40  ;;  %2305 = vmatprep.mubr.msk.f32.mxu1 %vm2930_vm0, %v2931_v1 }
 0x41b   : > { %2308 = vmatprep.subr.mxu1 %v2931_v1  ;;  %2463 = vmatpush3.bf16.msra.mxu0 %v2462_v34 }
 0x41c   : > { %2464 = vmatprep.subr.bf16.mxu0 %v2929_v0 }
 0x41d   : > { %2306 = vmatmul.mubr.msk.f32.vlgmr.msra.gmra.mrb[6].mxu1 %vm879_vm1, %v1048_v42 }
 0x41e   : > { %2310 = vmatprep.mubr.msk.f32.mxu1 %vm2930_vm0, %v2931_v1 }
 0x41f   : > { %2466 = vmatpush3.bf16.msra.mxu0 %v2465_v37 }
 0x420   : > { %2467 = vmatprep.subr.bf16.mxu0 %v2929_v0 }
 0x4ec   : > { %v1039_v43 = vpop.f32.mrb[4].mxu1 }
 0x4ed   : > { %v2302_v44 = vpop.f32.mrb[5].mxu1 }
 0x4f0   : > { %v1121_v45 = vpop.f32.mrb[6].mxu1 }
 0x4f1   : > { %v1125_v46 = vmul.f32 0.17677669, %v1121_v45  ;;  %v2307_v47 = vpop.f32.mrb[7].mxu1 }
 0x4f3   : > { %v1126_v48 = vsel %vm599_vm2, -1e+09, %v1125_v46 }
 0x4f4   : > { %v1127_v49 = vsel %vm958_vm3, %v1126_v48, -inf }
 0x4f5   : > { %1128 = vmax.xlane.f32.xlu0 %v1127_v49 }
 0x50b   : > { %1139 = vrot.lane.b32.xlu0 %v3427_v36, %s2932_s9 }
 0x50f   : > { %1367 = vrot.lane.b32.xlu0 %v3388_v55, %s2933_s12 }
 0x513   : > { %1365 = vrot.lane.b32.xlu0 %v3390_v58, %s2933_s12 }
 0x582   : > { %v1129_v50 = vpop.xlane.xlu0 %1128 }
 0x583   : > { %v1130_v51 = vsub.f32 %v1126_v48, %v1129_v50 }
 0x585   : > { %v1131_v52 = vmul.f32 1.442695, %v1130_v51 }
 0x586   : > { %v1140_v53 = vpop.permute.xlu0 %1139 }
 0x587   : > { %2587 = vpow2.f32 %v1131_v52  ;;  %2309 = vmatpush3.msra.mxu1 %v1140_v53 }
 0x588   : > { %2449 = vmatprep.subr.bf16.mxu1 %v2929_v0 }
 0x58a   : > { %v1368_v12 = vpop.permute.xlu0 %1367 }
 0x58e   : > { %v1366_v13 = vpop.permute.xlu0 %1365 }
 0x591   : > { %v2588_v54 = vpop.eup %2587 }
 0x592   : > { %v1133_v56 = vsel %vm958_vm3, %v2588_v54, 0.0 }
 0x593   : > { %1134 = vadd.xlane.f32.xlu1 %v1133_v56  ;;  %v1778_v56 = vld [vmem:[#allocation14 + $0x68] sm:$0xff] }
 0x5a4   : > { %1456 = vrot.lane.b32.xlu1 %v3427_v36, %s2933_s12 }
 0x5a8   : > { %1612 = vrot.lane.b32.xlu1 %v3388_v55, %s2934_s20  ;;  %v1043_v55 = vld [vmem:[#allocation14] sm:$0xff] }
 0x5a9   : > { %v2456_v6 = vpack.c.bf16 %v1044_v5, %v1043_v55 }
 0x620   : > { %v1135_v57 = vpop.xlane.xlu1 %1134 }
 0x621   : > { %2589 = vrcp.f32 %v1135_v57 }
 0x624   : > { %v1457_v14 = vpop.permute.xlu1 %1456 }
 0x628   : > { %v1613_v38 = vpop.permute.xlu1 %1612 }
 0x62b   : > { %v2590_v61 = vpop.eup %2589 }
 0x62c   : > { %v1137_v63 = vmul.f32 %v2590_v61, %v2588_v54  ;;  %v1777_v54 = vld [vmem:[#allocation14 + $0x60] sm:$0xff] }
 0x62d   : > { %v2468_v57 = vpack.c.bf16 %v1778_v56, %v1777_v54 }
 0x62e   : > { %2311 = vmatmul.mubr.msk.f32.vlgmr.msra.gmra.mrb[8].mxu1 %vm958_vm3, %v1137_v63 }
 0x62f   : > { %2451 = vmatpush3.bf16.msra.mxu1 %v2450_v62  ;;  %2321 = vmatprep.mubr.msk.f32.mxu1 %vm2930_vm0, %v2931_v1 }
 0x630   : > { %2452 = vmatprep.subr.bf16.mxu1 %v2929_v0 }
 0x633   : > { %2454 = vmatpush3.bf16.msra.mxu1 %v2453_v4 }
 0x634   : > { %2455 = vmatprep.subr.bf16.mxu1 %v2929_v0 }
 0x701   : > { %v1211_v9 = vpop.f32.mrb[8].mxu1 }
 0x702   : > { %v2312_v10 = vpop.f32.mrb[9].mxu1  ;;  %2322 = vmatmul.mubr.msk.f32.vlgmr.msra.gmra.mrb[10].mxu1 %vm879_vm1, %v1211_v9 }
 0x703   : > { %2457 = vmatpush3.bf16.msra.mxu1 %v2456_v6  ;;  %2332 = vmatprep.mubr.msk.f32.mxu1 %vm2930_vm0, %v2931_v1 }
 0x704   : > { %2458 = vmatprep.subr.bf16.mxu1 %v2929_v0 }
 0x707   : > { %2460 = vmatpush3.bf16.msra.mxu1 %v2459_v11 }
 0x708   : > { %2335 = vmatprep.subr.mxu1 %v2931_v1 }
 0x70a   : > { %2333 = vmatmul.mubr.msk.f32.vlgmr.msra.gmra.mrb[12].mxu1 %vm879_vm1, %v1039_v43 }
 0x70b   : > { %2337 = vmatprep.mubr.msk.f32.mxu1 %vm2930_vm0, %v2931_v1 }
 0x710   : > { %2336 = vmatpush3.xpose.msk.msra.mxu1 %vm879_vm1, %v1368_v12 }
 0x711   : > { %2340 = vmatprep.subr.mxu1 %v2931_v1 }
 0x713   : > { %2338 = vmatmul.mubr.msk.f32.vlgmr.msra.gmra.mrb[14].mxu1 %vm879_vm1, %v1366_v13 }
 0x714   : > { %2341 = vmatpush3.msra.mxu1 %v1457_v14  ;;  %2342 = vmatprep.mubr.msk.f32.mxu1 %vm2930_vm0, %v2931_v1 }
 0x715   : > { %2356 = vmatprep.subr.mxu1 %v2931_v1 }
 0x7d5   : > { %v1288_v15 = vpop.f32.mrb[10].mxu1 }
 0x7d6   : > { %v2323_v16 = vpop.f32.mrb[11].mxu1 }
 0x7dd   : > { %v1361_v17 = vpop.f32.mrb[12].mxu1 }
 0x7de   : > { %v3470_v18 = vadd.f32 %v1361_v17, %v1288_v15  ;;  %v2334_v19 = vpop.f32.mrb[13].mxu1 }
 0x7e6   : > { %v1439_v20 = vpop.f32.mrb[14].mxu1 }
 0x7e7   : > { %v1443_v21 = vmul.f32 0.17677669, %v1439_v20  ;;  %v2339_v22 = vpop.f32.mrb[15].mxu1 }
 0x7e9   : > { %v1444_v24 = vsel %vm599_vm2, -1e+09, %v1443_v21 }
 0x7ea   : > { %v1445_v25 = vsel %vm958_vm3, %v1444_v24, -inf }
 0x7eb   : > { %1446 = vmax.xlane.f32.xlu0 %v1445_v25 }
 0x878   : > { %v1447_v26 = vpop.xlane.xlu0 %1446 }
 0x879   : > { %v1448_v27 = vsub.f32 %v1444_v24, %v1447_v26 }
 0x87b   : > { %v1449_v28 = vmul.f32 1.442695, %v1448_v27 }
 0x87d   : > { %2591 = vpow2.f32 %v1449_v28 }
 0x887   : > { %v2592_v29 = vpop.eup %2591 }
 0x888   : > { %v1451_v30 = vsel %vm958_vm3, %v2592_v29, 0.0 }
 0x889   : > { %1452 = vadd.xlane.f32.xlu1 %v1451_v30 }
 0x89a   : > { %1610 = vrot.lane.b32.xlu1 %v3390_v58, %s2934_s20 }
 0x916   : > { %v1453_v39 = vpop.xlane.xlu1 %1452 }
 0x917   : > { %2593 = vrcp.f32 %v1453_v39 }
 0x91a   : > { %v1611_v58 = vpop.permute.xlu1 %1610 }
 0x921   : > { %v2594_v40 = vpop.eup %2593 }
 0x922   : > { %v1455_v41 = vmul.f32 %v2594_v40, %v2592_v29 }
 0x924   : > { %2343 = vmatmul.mubr.msk.f32.vlgmr.msra.gmra.mrb[16].mxu1 %vm958_vm3, %v1455_v41 }
 0x925   : > { %2357 = vmatpush3.xpose.msk.msra.mxu1 %vm879_vm1, %v1613_v38  ;;  %2358 = vmatprep.mubr.msk.f32.mxu1 %vm2930_vm0, %v2931_v1 }
 0x926   : > { %2361 = vmatprep.subr.mxu1 %v2931_v1 }
 0x928   : > { %2359 = vmatmul.mubr.msk.f32.vlgmr.msra.gmra.mrb[18].mxu1 %vm879_vm1, %v1611_v58 }
 0x929   : > { %2363 = vmatprep.mubr.msk.f32.mxu1 %vm2930_vm0, %v2931_v1 }
 0x9f7   : > { %v1528_v42 = vpop.f32.mrb[16].mxu1 }
 0x9f8   : > { %v2344_v43 = vpop.f32.mrb[17].mxu1  ;;  %2354 = vmatmul.mubr.msk.f32.vlgmr.msra.gmra.mrb[4].mxu0 %vm879_vm1, %v1528_v42 }
 0x9f9   : > { %2374 = vmatprep.mubr.msk.f32.mxu0 %vm2930_vm0, %v2931_v1  ;;  %2469 = vmatpush3.bf16.msra.mxu0 %v2468_v57 }
 0x9fa   : > { %2470 = vmatprep.subr.bf16.mxu0 %v2929_v0  ;;  %v2096_v0 = vld [vmem:[%s3638_s13] ss:$0 sm:$0xff] }
 0x9fb   : > { %v1684_v44 = vpop.f32.mrb[18].mxu1 }
 0x9fc   : > { %v1688_v45 = vmul.f32 0.17677669, %v1684_v44  ;;  %v2360_v46 = vpop.f32.mrb[19].mxu1 }
 0x9fd   : > { %2472 = vmatpush3.bf16.msra.mxu0 %v2471_v60 }
 0x9fe   : > { %v1689_v47 = vsel %vm599_vm2, -1e+09, %v1688_v45 }
 0x9ff   : > { %v1690_v48 = vsel %vm958_vm3, %v1689_v47, -inf }
 0xa00   : > { %1691 = vmax.xlane.f32.xlu0 %v1690_v48 }
 0xa16   : > { %1701 = vrot.lane.b32.xlu0 %v3427_v36, %s2934_s20 }
 0xa8d   : > { %v1692_v49 = vpop.xlane.xlu0 %1691 }
 0xa8e   : > { %v1693_v50 = vsub.f32 %v1689_v47, %v1692_v49 }
 0xa90   : > { %v1694_v51 = vmul.f32 1.442695, %v1693_v50 }
 0xa91   : > { %v1702_v52 = vpop.permute.xlu0 %1701 }
 0xa92   : > { %2595 = vpow2.f32 %v1694_v51  ;;  %2362 = vmatpush3.msra.mxu1 %v1702_v52 }
 0xa9c   : > { %v2596_v53 = vpop.eup %2595 }
 0xa9d   : > { %v1696_v1 = vsel %vm958_vm3, %v2596_v53, 0.0 }
 0xa9e   : > { %1697 = vadd.xlane.f32.xlu1 %v1696_v1 }
 0xacb   : > { %v1605_v36 = vpop.f32.mrb[4].mxu0 }
 0xacc   : > { %v1609_v61 = vadd.f32 %v1605_v36, %v3470_v18  ;;  %v2355_v62 = vpop.f32.mrb[5].mxu0 }
 0xb2b   : > { %v1698_v63 = vpop.xlane.xlu1 %1697 }
 0xb2c   : > { %2597 = vrcp.f32 %v1698_v63 }
 0xb36   : > { %v2598_v2 = vpop.eup %2597 }
 0xb37   : > { %v1700_v3 = vmul.f32 %v2598_v2, %v2596_v53 }
 0xb39   : > { %2364 = vmatmul.mubr.msk.f32.vlgmr.msra.gmra.mrb[20].mxu1 %vm958_vm3, %v1700_v3 }
 0xc0c   : > { %v1773_v4 = vpop.f32.mrb[20].mxu1 }
 0xc0d   : > { %v2365_v55 = vpop.f32.mrb[21].mxu1  ;;  %2375 = vmatmul.mubr.msk.f32.vlgmr.msra.gmra.mrb[6].mxu0 %vm879_vm1, %v1773_v4 }
 0xce0   : > { %v1850_v5 = vpop.f32.mrb[6].mxu0 }
 0xce1   : > { %v1854_v6 = vadd.f32 %v1850_v5, %v1609_v61  ;;  %v2376_v7 = vpop.f32.mrb[7].mxu0 }
 0xce3   : > { %v1862_v8 = vadd.f32 %v2096_v0, %v1854_v6 }
 0xce5   : > { %1863 = vst [vmem:[%s594_s18] sm:$0xff] %v1862_v8 }
 0xce6   : > { %2844 = shalt.err (!%p2841_p8)
}
 0xce7   : > { %s2845_s6 = scalar_lea.hbm %s3509_s30, 128  ;;  %s2849_s28 = scalar_lea.hbm %s3639_s7, 256 }
 0xce8   : > { %p2846_p12 = scmp.ne.s32.totalorder %s3509_s30, %s2845_s6  ;;  %p2850_p4 = scmp.lt.u32.totalorder %s3509_s30, %s3639_s7 }
 0xce9   : > { %p2851_p0 = scmp.lt.u32.totalorder %s2849_s28, %s2845_s6  ;;  %p2853_p7 = scmp.lt.u32.totalorder %s2845_s6, %s3509_s30 }
 0xcea   : > { %p2847_p5 = pnand %p2846_p12, %p3640_p9 }
 0xceb   : > { %p2852_p13 = por %p2851_p0, %p2850_p4 }
 0xcec   : > { %p2848_p2 = pneg %p2847_p5 }
 0xced   : > { %p2854_p11 = por %p2853_p7, %p2852_p13 }
 0xcef   : > { %p2855_p10 = pnand %p2854_p11, %p2848_p2 }
 0xcf1   : > { %2858 = shalt.err (!%p2855_p10)
}
 0xcf2   : > { %2497 = dma.vmem_to_hbm [thread:$0]  (%p3640_p9), %s3511_s21, 128, %s3509_s30, %s1865_s4  }
 0xcf3 PF: > { %s3641_s20 = sld [smem:[#allocation24_spill]]  ;;  %s3642_s1 = sld [smem:[#allocation25_spill]] }
 0xcf4   : > { %p3644_p6 = scmp.ge.s32.totalorder %s2917_s24, 2 }
 0xcf9   : > { %s1890_s29 = sand.u32 1, %s3641_s20   ;;  %p3643_p3 = scmp.ne.s32.totalorder %s3642_s1, 0 }
 0xcfa   : > { %s1891_s13 = scalar_lea.sflag [#allocation4], %s1890_s29 }
 0xcfb   : > { %p2526_p1 = pnand %p3644_p6, %p3643_p3 }
 0xcfd   : > { %2900 = dma.done.wait (!%p2526_p1), %s1891_s13, 128  }
 0xcfe   : > { %2902 = vsyncadd (!%p2526_p1), %s1891_s13, 4294967168  ;;  %s3645_s24 = sld [smem:[#allocation26_spill]]  ;;  %s3646_s26 = sld [smem:[#allocation28_spill]] }
 0xcff   : > { %s3647_s21 = smov %s2909_s22  ;;  %s3648_s22 = smov %s2913_s23 }
 0xd04   : > { %p33_p8 = scmp.ge.s32.totalorder %s3645_s24, 4   ;;  %s3649_s23 = smov %s3646_s26 }
 0xd06   :  { %35 = sbr.rel (!%p33_p8) target bundleno = 20 (0x14), region = 166 }
 0xd0d   :  { %1896 = vsyncpa [#allocation3], 1 }
 0xd0e   :  { %1898 = vsyncpa [#allocation3 + $0x1], 1 }
 0xd0f   :  { %1899 = vsyncpa [#allocation6], 1 }
 0xd10   :  { %1901 = vsyncpa [#allocation6 + $0x1], 1 }
 0xd11   :  { %1902 = vsyncpa [#allocation9], 1 }
 0xd12   :  { %1904 = vsyncpa [#allocation9 + $0x1], 1 }
 0xd13   :  { %1905 = vsyncpa [#allocation12], 1 }
 0xd14   :  { %1906 = vsyncpa [#allocation15], 1 }
 0xd15   :  { %1907 = vsyncpa [#allocation4], 1 }
 0xd16   :  { %1909 = vsyncpa [#allocation4 + $0x1], 1 }

</bundles_post_ra>
